<compile_context>
chip_gen: v7x
topology: tpu7x:2x2x1
jax: 0.10.0
libtpu: 0.0.40
codegen_flags: <defaults>
</compile_context>

<pallas_src>
import functools

import jax
import jax.numpy as jnp
from jax.experimental import pallas as pl
from jax.experimental.pallas import tpu as pltpu

# ---------------------------------------------------------------------------
# Model constants (synthetic srlane-style detector)
# ---------------------------------------------------------------------------
NUM_PRIORS = 8          # lane proposals produced by the rpn head
PRIOR_DIM = 4           # parameters per proposal
CP = 128                # padded (lane-dense) channel width used everywhere
C_IN, C1, C2, CN = 4, 16, 32, 32       # true channel counts
HW = 4 * 4                              # neck spatial positions (after two stride-2 convs)
RPN_OUT = NUM_PRIORS * PRIOR_DIM + NUM_PRIORS   # 32 proposal params + 8 scores = 40
ATT_SCALE = 1.0 / float(CN) ** 0.5


def _round_up(x, m):
    return ((x + m - 1) // m) * m


# ---------------------------------------------------------------------------
# Kernel 1: generic tiled matmul + bias (+ReLU)
# ---------------------------------------------------------------------------
def _mm_kernel(x_ref, w_ref, b_ref, o_ref, acc_ref, *, relu):
    k = pl.program_id(2)

    @pl.when(k == 0)
    def _():
        acc_ref[...] = jnp.zeros_like(acc_ref)

    acc_ref[...] += jnp.dot(x_ref[...].astype(jnp.bfloat16),
                            w_ref[...].astype(jnp.bfloat16),
                            preferred_element_type=jnp.float32)

    @pl.when(k == pl.num_programs(2) - 1)
    def _():
        r = acc_ref[...] + b_ref[...]
        if relu:
            r = jnp.maximum(r, 0.0)
        o_ref[...] = r.astype(o_ref.dtype)


def matmul_bias_act(x, w, b, relu=False, tm=256, tn=256, tk=512):
    """Tiled, pipelined (M,K)@(K,N)+bias(+ReLU). Pads ragged dims to MXU-friendly sizes."""
    M, K = x.shape
    K2, N = w.shape
    assert K == K2, (K, K2)
    tm = min(tm, _round_up(M, 8))
    tn = min(tn, _round_up(N, 128))
    tk = min(tk, _round_up(K, 128))
    Mp, Kp, Np = _round_up(M, tm), _round_up(K, tk), _round_up(N, tn)
    xp = jnp.pad(x, ((0, Mp - M), (0, Kp - K)))
    wp = jnp.pad(w, ((0, Kp - K), (0, Np - N)))
    bp = jnp.pad(b.reshape(1, -1), ((0, 0), (0, Np - N)))

    out = pl.pallas_call(
        functools.partial(_mm_kernel, relu=relu),
        out_shape=jax.ShapeDtypeStruct((Mp, Np), jnp.float32),
        grid=(Mp // tm, Np // tn, Kp // tk),
        in_specs=[
            pl.BlockSpec((tm, tk), lambda i, j, k: (i, k)),
            pl.BlockSpec((tk, tn), lambda i, j, k: (k, j)),
            pl.BlockSpec((1, tn), lambda i, j, k: (0, j)),
        ],
        out_specs=pl.BlockSpec((tm, tn), lambda i, j, k: (i, j)),
        scratch_shapes=[pltpu.VMEM((tm, tn), jnp.float32)],
        compiler_params=pltpu.CompilerParams(
            dimension_semantics=("parallel", "parallel", "arbitrary")),
    )(xp, wp, bp)
    return out[:M, :N]


# ---------------------------------------------------------------------------
# Kernel 2: conv2 GEMM (K-tiled) with the neck 1x1 conv fused in the finalize
# ---------------------------------------------------------------------------
def _conv2_neck_kernel(x_ref, w2_ref, b2_ref, wn_ref, bn_ref, o_ref, acc_ref):
    k = pl.program_id(0)

    @pl.when(k == 0)
    def _():
        acc_ref[...] = jnp.zeros_like(acc_ref)

    acc_ref[...] += jnp.dot(x_ref[...].astype(jnp.bfloat16),
                            w2_ref[...].astype(jnp.bfloat16),
                            preferred_element_type=jnp.float32)

    @pl.when(k == pl.num_programs(0) - 1)
    def _():
        y = jnp.maximum(acc_ref[...] + b2_ref[...], 0.0)          # conv2 + ReLU
        neck = jnp.dot(y.astype(jnp.bfloat16), wn_ref[...].astype(jnp.bfloat16),
                       preferred_element_type=jnp.float32) + bn_ref[...]
        o_ref[...] = jnp.maximum(neck, 0.0)                        # neck 1x1 + ReLU


def conv2_neck(cols, w2, b2, wn, bn, tk=512):
    M, K = cols.shape
    Mp = _round_up(M, 8)
    Kp = _round_up(K, tk)
    xp = jnp.pad(cols, ((0, Mp - M), (0, Kp - K)))
    w2p = jnp.pad(w2, ((0, Kp - K), (0, 0)))

    out = pl.pallas_call(
        _conv2_neck_kernel,
        out_shape=jax.ShapeDtypeStruct((Mp, CP), jnp.float32),
        grid=(Kp // tk,),
        in_specs=[
            pl.BlockSpec((Mp, tk), lambda k: (0, k)),
            pl.BlockSpec((tk, CP), lambda k: (k, 0)),
            pl.BlockSpec((1, CP), lambda k: (0, 0)),
            pl.BlockSpec((CP, CP), lambda k: (0, 0)),
            pl.BlockSpec((1, CP), lambda k: (0, 0)),
        ],
        out_specs=pl.BlockSpec((Mp, CP), lambda k: (0, 0)),
        scratch_shapes=[pltpu.VMEM((Mp, CP), jnp.float32)],
        compiler_params=pltpu.CompilerParams(dimension_semantics=("arbitrary",)),
    )(xp, w2p, b2.reshape(1, -1), wn, bn.reshape(1, -1))
    return out[:M]


# ---------------------------------------------------------------------------
# Kernel 3: fused heads (rpn + roi attention pooling + roi MLP), grid over batch
# ---------------------------------------------------------------------------
def _heads_kernel(fvec_ref, neck_ref, rpn_w_ref, rpn_b_ref, wq_ref, bq_ref,
                  w1_ref, b1_ref, wcr_ref, bcr_ref,
                  rpn_out_ref, roi_out_ref, pri_ref):
    # ---- rpn head: one dense GEMM over the flattened (padded) neck features.
    fvec = fvec_ref[0]                                             # (1, HW*CP)
    rpn_row = jnp.dot(fvec.astype(jnp.bfloat16),
                      rpn_w_ref[...].astype(jnp.bfloat16),
                      preferred_element_type=jnp.float32) + rpn_b_ref[...]   # (1, CP)
    rpn_out_ref[0] = rpn_row          # cols 0:32 proposal params, 32:40 scores, rest 0

    # ---- scatter flat proposal params into a (P, CP) matrix (cols >= PRIOR_DIM are 0)
    pri_ref[...] = jnp.zeros_like(pri_ref)
    for p in range(NUM_PRIORS):       # static unroll, tiny masked stores
        pri_ref[p:p + 1, 0:PRIOR_DIM] = rpn_row[0:1, p * PRIOR_DIM:(p + 1) * PRIOR_DIM]
    pri = pri_ref[...]                                             # (P, CP)

    neck = neck_ref[0]                                             # (HW, CP)

    # ---- roi head: prior-guided attention pooling
    q = jnp.dot(pri, wq_ref[...], preferred_element_type=jnp.float32) + bq_ref[...]
    s = jax.lax.dot_general(q, neck, (((1,), (1,)), ((), ())),
                            preferred_element_type=jnp.float32) * ATT_SCALE  # (P, HW)
    m = jnp.max(s, axis=-1, keepdims=True)
    e = jnp.exp(s - m)
    attn = e * pl.reciprocal(jnp.sum(e, axis=-1, keepdims=True), approx=True)
    pooled = jnp.dot(attn, neck, preferred_element_type=jnp.float32)         # (P, CP)

    # ---- roi MLP + combined [reg(4) | cls(2)] head; reg residual-added to priors
    h = jnp.maximum(jnp.dot(pooled, w1_ref[...], preferred_element_type=jnp.float32)
                    + b1_ref[...], 0.0)
    out = jnp.dot(h, wcr_ref[...], preferred_element_type=jnp.float32) + bcr_ref[...]
    roi_out_ref[0] = out + pri        # cols 0:4 reg = priors + delta, 4:6 cls, rest 0


def fused_heads(fvec, neck3, params):
    N = fvec.shape[0]
    F = fvec.shape[-1]
    return pl.pallas_call(
        _heads_kernel,
        out_shape=(jax.ShapeDtypeStruct((N, 1, CP), jnp.float32),
                   jax.ShapeDtypeStruct((N, NUM_PRIORS, CP), jnp.float32)),
        grid=(N,),
        in_specs=[
            pl.BlockSpec((1, 1, F), lambda b: (b, 0, 0)),
            pl.BlockSpec((1, HW, CP), lambda b: (b, 0, 0)),
            pl.BlockSpec((F, CP), lambda b: (0, 0)),
            pl.BlockSpec((1, CP), lambda b: (0, 0)),
            pl.BlockSpec((CP, CP), lambda b: (0, 0)),
            pl.BlockSpec((1, CP), lambda b: (0, 0)),
            pl.BlockSpec((CP, CP), lambda b: (0, 0)),
            pl.BlockSpec((1, CP), lambda b: (0, 0)),
            pl.BlockSpec((CP, CP), lambda b: (0, 0)),
            pl.BlockSpec((1, CP), lambda b: (0, 0)),
        ],
        out_specs=(pl.BlockSpec((1, 1, CP), lambda b: (b, 0, 0)),
                   pl.BlockSpec((1, NUM_PRIORS, CP), lambda b: (b, 0, 0))),
        scratch_shapes=[pltpu.VMEM((NUM_PRIORS, CP), jnp.float32)],
        compiler_params=pltpu.CompilerParams(dimension_semantics=("parallel",)),
    )(fvec, neck3,
      params["rpn_w"], params["rpn_b"].reshape(1, -1),
      params["roi_wq"], params["roi_bq"].reshape(1, -1),
      params["roi_w1"], params["roi_b1"].reshape(1, -1),
      params["roi_wcr"], params["roi_bcr"].reshape(1, -1))


# ---------------------------------------------------------------------------
# Glue: im2col (data rearrangement only; all matmul compute stays in Pallas)
# ---------------------------------------------------------------------------
def im2col(x_nhwc, kh, kw, stride, pad):
    N, H, W, C = x_nhwc.shape
    xp = jnp.pad(x_nhwc, ((0, 0), (pad, pad), (pad, pad), (0, 0)))
    Ho = (H + 2 * pad - kh) // stride + 1
    Wo = (W + 2 * pad - kw) // stride + 1
    cols = []
    for i in range(kh):
        for j in range(kw):
            cols.append(xp[:, i:i + stride * Ho:stride, j:j + stride * Wo:stride, :])
    patches = jnp.stack(cols, axis=3)                  # [N, Ho, Wo, kh*kw, C]
    return patches.reshape(N * Ho * Wo, kh * kw * C), (N, Ho, Wo)


# ---------------------------------------------------------------------------
# Detector forward (inference branch of TwoStageDetector.forward)
# ---------------------------------------------------------------------------
def two_stage_detector_forward(x_nchw, params):
    x = jnp.transpose(x_nchw, (0, 2, 3, 1)).astype(jnp.float32)    # NCHW -> NHWC

    # ---- backbone conv1: strided 3x3 + ReLU (16 -> 8 spatial), padded to 128 channels
    cols1, (N, H1, W1) = im2col(x, 3, 3, stride=2, pad=1)          # (N*64, 36)
    feat1 = matmul_bias_act(cols1, params["bb_w1"], params["bb_b1"], relu=True)
    feat1 = feat1.reshape(N, H1, W1, CP)                           # (2, 8, 8, 128)

    # ---- backbone conv2 + neck 1x1, fused in one kernel (8 -> 4 spatial)
    cols2, (N, H2, W2) = im2col(feat1, 3, 3, stride=2, pad=1)      # (N*16, 1152)
    neck = conv2_neck(cols2, params["bb_w2"], params["bb_b2"],
                      params["neck_w"], params["neck_b"])          # (N*16, 128)

    # Two free (bitcast) views of the neck features for the fused heads kernel.
    neck3 = neck.reshape(N, H2 * W2, CP)                           # (2, 16, 128)
    fvec = neck.reshape(N, 1, H2 * W2 * CP)                        # (2, 1, 2048)

    # ---- fused rpn + roi heads, gridded over batch
    rpn_out, roi_out = fused_heads(fvec, neck3, params)
    rpn_flat = rpn_out[:, 0, :]                                    # (N, 128)
    rpn_logits = rpn_flat[:, NUM_PRIORS * PRIOR_DIM:NUM_PRIORS * PRIOR_DIM + NUM_PRIORS]
    reg = roi_out[:, :, :PRIOR_DIM]                                # priors + delta
    cls = roi_out[:, :, PRIOR_DIM:PRIOR_DIM + 2]

    # TODO(synk): training branch (rpn_head.loss / roi_head.loss) not implemented.
    return {"rpn_logits": rpn_logits, "roi_cls": cls, "roi_reg": reg}


# ---------------------------------------------------------------------------
# Deterministic parameter construction (synthetic; padded to lane-dense shapes)
# ---------------------------------------------------------------------------
def make_params():
    ks = jax.random.split(jax.random.PRNGKey(42), 8)

    def w(k, shape, scale=0.1):
        return scale * jax.random.normal(k, shape, dtype=jnp.float32)

    def padded(base, out_shape):
        z = jnp.zeros(out_shape, jnp.float32)
        return z.at[tuple(slice(0, s) for s in base.shape)].set(base)

    # conv1: (3*3*C_IN, C1) embedded in (36, 128)
    bb_w1 = padded(w(ks[0], (3 * 3 * C_IN, C1)), (3 * 3 * C_IN, CP))
    # conv2: (3,3,C1,C2) embedded in (3,3,128,128), flattened to (1152, 128)
    w2_full = jnp.zeros((3, 3, CP, CP), jnp.float32).at[:, :, :C1, :C2].set(
        w(ks[1], (3, 3, C1, C2)))
    bb_w2 = w2_full.reshape(3 * 3 * CP, CP)
    # neck 1x1: (C2, CN) embedded in (128, 128)
    neck_w = padded(w(ks[2], (C2, CN)), (CP, CP))
    # rpn combined [proposal(32) | score(8)] head over flattened (HW, CN) features,
    # embedded in (HW*128, 128)
    rpn_full = jnp.zeros((HW, CP, CP), jnp.float32).at[:, :CN, :RPN_OUT].set(
        w(ks[3], (HW, CN, RPN_OUT)))
    rpn_w = rpn_full.reshape(HW * CP, CP)
    # roi attention query projection: (PRIOR_DIM, CN) embedded in (128, 128)
    roi_wq = padded(w(ks[4], (PRIOR_DIM, CN)), (CP, CP))
    # roi MLP + combined [reg(4) | cls(2)] head, embedded in (128, 128)
    roi_w1 = padded(w(ks[5], (CN, CN)), (CP, CP))
    roi_wcr = padded(w(ks[6], (CN, PRIOR_DIM + 2)), (CP, CP))

    zeros = lambda: jnp.zeros((CP,), jnp.float32)
    return {
        "bb_w1": bb_w1, "bb_b1": zeros(),
        "bb_w2": bb_w2, "bb_b2": zeros(),
        "neck_w": neck_w, "neck_b": zeros(),
        "rpn_w": rpn_w, "rpn_b": zeros(),
        "roi_wq": roi_wq, "roi_bq": zeros(),
        "roi_w1": roi_w1, "roi_b1": zeros(),
        "roi_wcr": roi_wcr, "roi_bcr": zeros(),
    }


if __name__ == "__main__":
    params = make_params()
    x = jax.random.normal(jax.random.PRNGKey(0), (2, 4, 16, 16), dtype=jnp.float32)
    out = jax.jit(two_stage_detector_forward)(x, params)
    jax.block_until_ready(out)
    assert out["rpn_logits"].shape == (2, NUM_PRIORS)
    assert out["roi_cls"].shape == (2, NUM_PRIORS, 2)
    assert out["roi_reg"].shape == (2, NUM_PRIORS, PRIOR_DIM)
    assert bool(jnp.all(jnp.isfinite(out["roi_reg"])))
    assert bool(jnp.all(jnp.isfinite(out["roi_cls"])))
    print("KERNEL_OK")
</pallas_src>

<mosaic_0001>
module attributes {stable_mosaic.version = 11 : i64} {
  func.func @_mm_kernel(%arg0: i32, %arg1: i32, %arg2: i32, %arg3: memref<128x128xf32, #tpu.memory_space<vmem>>, %arg4: memref<128x128xf32, #tpu.memory_space<vmem>>, %arg5: memref<1x128xf32, #tpu.memory_space<vmem>>, %arg6: memref<128x128xf32, #tpu.memory_space<vmem>>, %arg7: memref<128x128xf32, #tpu.memory_space<vmem>>) attributes {dimension_semantics = [#tpu.dimension_semantics<parallel>, #tpu.dimension_semantics<parallel>, #tpu.dimension_semantics<arbitrary>], iteration_bounds = array<i64: 1, 1, 1>, scalar_prefetch = 0 : i64, scratch_operands = 1 : i64, tpu.core_type = #tpu.core_type<tc>, window_params = [{transform_indices = @transform_0, window_bounds = array<i64: 128, 128>}, {transform_indices = @transform_1, window_bounds = array<i64: 128, 128>}, {transform_indices = @transform_2, window_bounds = array<i64: 1, 128>}, {transform_indices = @transform_3, window_bounds = array<i64: 128, 128>}]} {
    %c0_i32 = arith.constant 0 : i32
    %0 = arith.cmpi eq, %arg2, %c0_i32 : i32
    %1 = arith.extui %0 : i1 to i32
    %c0_i32_0 = arith.constant 0 : i32
    %2 = arith.cmpi ne, %1, %c0_i32_0 : i32
    scf.if %2 {
      %cst_10 = arith.constant 0.000000e+00 : f32
      %14 = vector.broadcast %cst_10 : f32 to vector<128x128xf32>
      %c0_11 = arith.constant 0 : index
      %c0_12 = arith.constant 0 : index
      %15 = vector.load %arg7[%c0_11, %c0_12] : memref<128x128xf32, #tpu.memory_space<vmem>>, vector<128x128xf32>
      tpu.vector_store %arg7[%c0_11, %c0_12], %14 {strides = array<i32>} : memref<128x128xf32, #tpu.memory_space<vmem>>, vector<128x128xf32>,
    } else {
    }
    %c0 = arith.constant 0 : index
    %c0_1 = arith.constant 0 : index
    %3 = vector.load %arg7[%c0, %c0_1] : memref<128x128xf32, #tpu.memory_space<vmem>>, vector<128x128xf32>
    %c0_2 = arith.constant 0 : index
    %c0_3 = arith.constant 0 : index
    %4 = vector.load %arg3[%c0_2, %c0_3] : memref<128x128xf32, #tpu.memory_space<vmem>>, vector<128x128xf32>
    %5 = arith.truncf %4 : vector<128x128xf32> to vector<128x128xbf16>
    %c0_4 = arith.constant 0 : index
    %c0_5 = arith.constant 0 : index
    %6 = vector.load %arg4[%c0_4, %c0_5] : memref<128x128xf32, #tpu.memory_space<vmem>>, vector<128x128xf32>
    %7 = arith.truncf %6 : vector<128x128xf32> to vector<128x128xbf16>
    %cst = arith.constant dense<0.000000e+00> : vector<128x128xf32>
    %8 = tpu.matmul %5, %7, %cst {dimension_numbers = #tpu.dot_dimension_numbers<[1], [0], [0], [1], [0, 0, 1, 1], [], []>} : vector<128x128xbf16>, vector<128x128xbf16>, vector<128x128xf32> -> vector<128x128xf32>
    %9 = arith.addf %3, %8 : vector<128x128xf32>
    %c0_6 = arith.constant 0 : index
    %c0_7 = arith.constant 0 : index
    %10 = vector.load %arg7[%c0_6, %c0_7] : memref<128x128xf32, #tpu.memory_space<vmem>>, vector<128x128xf32>
    tpu.vector_store %arg7[%c0_6, %c0_7], %9 {strides = array<i32>} : memref<128x128xf32, #tpu.memory_space<vmem>>, vector<128x128xf32>,
    %c0_i32_8 = arith.constant 0 : i32
    %11 = arith.cmpi eq, %arg2, %c0_i32_8 : i32
    %12 = arith.extui %11 : i1 to i32
    %c0_i32_9 = arith.constant 0 : i32
    %13 = arith.cmpi ne, %12, %c0_i32_9 : i32
    scf.if %13 {
      %c0_10 = arith.constant 0 : index
      %c0_11 = arith.constant 0 : index
      %14 = vector.load %arg7[%c0_10, %c0_11] : memref<128x128xf32, #tpu.memory_space<vmem>>, vector<128x128xf32>
      %c0_12 = arith.constant 0 : index
      %c0_13 = arith.constant 0 : index
      %15 = vector.load %arg5[%c0_12, %c0_13] : memref<1x128xf32, #tpu.memory_space<vmem>>, vector<1x128xf32>
      %16 = vector.broadcast %15 : vector<1x128xf32> to vector<128x128xf32>
      %17 = arith.addf %14, %16 : vector<128x128xf32>
      %cst_14 = arith.constant 0.000000e+00 : f32
      %18 = vector.broadcast %cst_14 : f32 to vector<128x128xf32>
      %19 = arith.maximumf %17, %18 : vector<128x128xf32>
      %c0_15 = arith.constant 0 : index
      %c0_16 = arith.constant 0 : index
      %20 = vector.load %arg6[%c0_15, %c0_16] : memref<128x128xf32, #tpu.memory_space<vmem>>, vector<128x128xf32>
      tpu.vector_store %arg6[%c0_15, %c0_16], %19 {strides = array<i32>} : memref<128x128xf32, #tpu.memory_space<vmem>>, vector<128x128xf32>,
    } else {
    }
    return
  }
  func.func @transform_0(%arg0: i32, %arg1: i32, %arg2: i32) -> (i32, i32) {
    %c0_i32 = arith.constant 0 : i32
    return %arg0, %arg2 : i32, i32
  }
  func.func @transform_1(%arg0: i32, %arg1: i32, %arg2: i32) -> (i32, i32) {
    %c0_i32 = arith.constant 0 : i32
    return %arg2, %arg1 : i32, i32
  }
  func.func @transform_2(%arg0: i32, %arg1: i32, %arg2: i32) -> (i32, i32) {
    %c0_i32 = arith.constant 0 : i32
    %c0_i32_0 = arith.constant 0 : i32
    return %c0_i32, %arg1 : i32, i32
  }
  func.func @transform_3(%arg0: i32, %arg1: i32, %arg2: i32) -> (i32, i32) {
    %c0_i32 = arith.constant 0 : i32
    return %arg0, %arg1 : i32, i32
  }
}

module attributes {stable_mosaic.version = 11 : i64} {
  func.func @_conv2_neck_kernel(%arg0: i32, %arg1: memref<32x512xf32, #tpu.memory_space<vmem>>, %arg2: memref<512x128xf32, #tpu.memory_space<vmem>>, %arg3: memref<1x128xf32, #tpu.memory_space<vmem>>, %arg4: memref<128x128xf32, #tpu.memory_space<vmem>>, %arg5: memref<1x128xf32, #tpu.memory_space<vmem>>, %arg6: memref<32x128xf32, #tpu.memory_space<vmem>>, %arg7: memref<32x128xf32, #tpu.memory_space<vmem>>) attributes {dimension_semantics = [#tpu.dimension_semantics<arbitrary>], iteration_bounds = array<i64: 3>, scalar_prefetch = 0 : i64, scratch_operands = 1 : i64, tpu.core_type = #tpu.core_type<tc>, window_params = [{transform_indices = @transform_0, window_bounds = array<i64: 32, 512>}, {transform_indices = @transform_1, window_bounds = array<i64: 512, 128>}, {pipeline_mode = #tpu.pipeline_mode<synchronous>, transform_indices = @transform_2, window_bounds = array<i64: 1, 128>}, {pipeline_mode = #tpu.pipeline_mode<synchronous>, transform_indices = @transform_3, window_bounds = array<i64: 128, 128>}, {pipeline_mode = #tpu.pipeline_mode<synchronous>, transform_indices = @transform_4, window_bounds = array<i64: 1, 128>}, {pipeline_mode = #tpu.pipeline_mode<synchronous>, transform_indices = @transform_5, window_bounds = array<i64: 32, 128>}]} {
    %c0_i32 = arith.constant 0 : i32
    %0 = arith.cmpi eq, %arg0, %c0_i32 : i32
    %1 = arith.extui %0 : i1 to i32
    %c0_i32_0 = arith.constant 0 : i32
    %2 = arith.cmpi ne, %1, %c0_i32_0 : i32
    scf.if %2 {
      %cst_9 = arith.constant 0.000000e+00 : f32
      %14 = vector.broadcast %cst_9 : f32 to vector<32x128xf32>
      %c0_10 = arith.constant 0 : index
      %c0_11 = arith.constant 0 : index
      %15 = vector.load %arg7[%c0_10, %c0_11] : memref<32x128xf32, #tpu.memory_space<vmem>>, vector<32x128xf32>
      tpu.vector_store %arg7[%c0_10, %c0_11], %14 {strides = array<i32>} : memref<32x128xf32, #tpu.memory_space<vmem>>, vector<32x128xf32>,
    } else {
    }
    %c0 = arith.constant 0 : index
    %c0_1 = arith.constant 0 : index
    %3 = vector.load %arg7[%c0, %c0_1] : memref<32x128xf32, #tpu.memory_space<vmem>>, vector<32x128xf32>
    %c0_2 = arith.constant 0 : index
    %c0_3 = arith.constant 0 : index
    %4 = vector.load %arg1[%c0_2, %c0_3] : memref<32x512xf32, #tpu.memory_space<vmem>>, vector<32x512xf32>
    %5 = arith.truncf %4 : vector<32x512xf32> to vector<32x512xbf16>
    %c0_4 = arith.constant 0 : index
    %c0_5 = arith.constant 0 : index
    %6 = vector.load %arg2[%c0_4, %c0_5] : memref<512x128xf32, #tpu.memory_space<vmem>>, vector<512x128xf32>
    %7 = arith.truncf %6 : vector<512x128xf32> to vector<512x128xbf16>
    %cst = arith.constant dense<0.000000e+00> : vector<32x128xf32>
    %8 = tpu.matmul %5, %7, %cst {dimension_numbers = #tpu.dot_dimension_numbers<[1], [0], [0], [1], [0, 0, 1, 1], [], []>} : vector<32x512xbf16>, vector<512x128xbf16>, vector<32x128xf32> -> vector<32x128xf32>
    %9 = arith.addf %3, %8 : vector<32x128xf32>
    %c0_6 = arith.constant 0 : index
    %c0_7 = arith.constant 0 : index
    %10 = vector.load %arg7[%c0_6, %c0_7] : memref<32x128xf32, #tpu.memory_space<vmem>>, vector<32x128xf32>
    tpu.vector_store %arg7[%c0_6, %c0_7], %9 {strides = array<i32>} : memref<32x128xf32, #tpu.memory_space<vmem>>, vector<32x128xf32>,
    %c2_i32 = arith.constant 2 : i32
    %11 = arith.cmpi eq, %arg0, %c2_i32 : i32
    %12 = arith.extui %11 : i1 to i32
    %c0_i32_8 = arith.constant 0 : i32
    %13 = arith.cmpi ne, %12, %c0_i32_8 : i32
    scf.if %13 {
      %c0_9 = arith.constant 0 : index
      %c0_10 = arith.constant 0 : index
      %14 = vector.load %arg7[%c0_9, %c0_10] : memref<32x128xf32, #tpu.memory_space<vmem>>, vector<32x128xf32>
      %c0_11 = arith.constant 0 : index
      %c0_12 = arith.constant 0 : index
      %15 = vector.load %arg3[%c0_11, %c0_12] : memref<1x128xf32, #tpu.memory_space<vmem>>, vector<1x128xf32>
      %16 = vector.broadcast %15 : vector<1x128xf32> to vector<32x128xf32>
      %17 = arith.addf %14, %16 : vector<32x128xf32>
      %cst_13 = arith.constant 0.000000e+00 : f32
      %18 = vector.broadcast %cst_13 : f32 to vector<32x128xf32>
      %19 = arith.maximumf %17, %18 : vector<32x128xf32>
      %20 = arith.truncf %19 : vector<32x128xf32> to vector<32x128xbf16>
      %c0_14 = arith.constant 0 : index
      %c0_15 = arith.constant 0 : index
      %21 = vector.load %arg4[%c0_14, %c0_15] : memref<128x128xf32, #tpu.memory_space<vmem>>, vector<128x128xf32>
      %22 = arith.truncf %21 : vector<128x128xf32> to vector<128x128xbf16>
      %cst_16 = arith.constant dense<0.000000e+00> : vector<32x128xf32>
      %23 = tpu.matmul %20, %22, %cst_16 {dimension_numbers = #tpu.dot_dimension_numbers<[1], [0], [0], [1], [0, 0, 1, 1], [], []>} : vector<32x128xbf16>, vector<128x128xbf16>, vector<32x128xf32> -> vector<32x128xf32>
      %c0_17 = arith.constant 0 : index
      %c0_18 = arith.constant 0 : index
      %24 = vector.load %arg5[%c0_17, %c0_18] : memref<1x128xf32, #tpu.memory_space<vmem>>, vector<1x128xf32>
      %25 = vector.broadcast %24 : vector<1x128xf32> to vector<32x128xf32>
      %26 = arith.addf %23, %25 : vector<32x128xf32>
      %cst_19 = arith.constant 0.000000e+00 : f32
      %27 = vector.broadcast %cst_19 : f32 to vector<32x128xf32>
      %28 = arith.maximumf %26, %27 : vector<32x128xf32>
      %c0_20 = arith.constant 0 : index
      %c0_21 = arith.constant 0 : index
      %29 = vector.load %arg6[%c0_20, %c0_21] : memref<32x128xf32, #tpu.memory_space<vmem>>, vector<32x128xf32>
      tpu.vector_store %arg6[%c0_20, %c0_21], %28 {strides = array<i32>} : memref<32x128xf32, #tpu.memory_space<vmem>>, vector<32x128xf32>,
    } else {
    }
    return
  }
  func.func @transform_0(%arg0: i32) -> (i32, i32) {
    %c0_i32 = arith.constant 0 : i32
    %c0_i32_0 = arith.constant 0 : i32
    return %c0_i32, %arg0 : i32, i32
  }
  func.func @transform_1(%arg0: i32) -> (i32, i32) {
    %c0_i32 = arith.constant 0 : i32
    %c0_i32_0 = arith.constant 0 : i32
    return %arg0, %c0_i32 : i32, i32
  }
  func.func @transform_2(%arg0: i32) -> (i32, i32) {
    %c0_i32 = arith.constant 0 : i32
    %c0_i32_0 = arith.constant 0 : i32
    %c0_i32_1 = arith.constant 0 : i32
    return %c0_i32, %c0_i32_0 : i32, i32
  }
  func.func @transform_3(%arg0: i32) -> (i32, i32) {
    %c0_i32 = arith.constant 0 : i32
    %c0_i32_0 = arith.constant 0 : i32
    %c0_i32_1 = arith.constant 0 : i32
    return %c0_i32, %c0_i32_0 : i32, i32
  }
  func.func @transform_4(%arg0: i32) -> (i32, i32) {
    %c0_i32 = arith.constant 0 : i32
    %c0_i32_0 = arith.constant 0 : i32
    %c0_i32_1 = arith.constant 0 : i32
    return %c0_i32, %c0_i32_0 : i32, i32
  }
  func.func @transform_5(%arg0: i32) -> (i32, i32) {
    %c0_i32 = arith.constant 0 : i32
    %c0_i32_0 = arith.constant 0 : i32
    %c0_i32_1 = arith.constant 0 : i32
    return %c0_i32, %c0_i32_0 : i32, i32
  }
}

module attributes {stable_mosaic.version = 11 : i64} {
  func.func @_heads_kernel(%arg0: i32, %arg1: memref<1x1x2048xf32, #tpu.memory_space<vmem>>, %arg2: memref<1x16x128xf32, #tpu.memory_space<vmem>>, %arg3: memref<2048x128xf32, #tpu.memory_space<vmem>>, %arg4: memref<1x128xf32, #tpu.memory_space<vmem>>, %arg5: memref<128x128xf32, #tpu.memory_space<vmem>>, %arg6: memref<1x128xf32, #tpu.memory_space<vmem>>, %arg7: memref<128x128xf32, #tpu.memory_space<vmem>>, %arg8: memref<1x128xf32, #tpu.memory_space<vmem>>, %arg9: memref<128x128xf32, #tpu.memory_space<vmem>>, %arg10: memref<1x128xf32, #tpu.memory_space<vmem>>, %arg11: memref<1x1x128xf32, #tpu.memory_space<vmem>>, %arg12: memref<1x8x128xf32, #tpu.memory_space<vmem>>, %arg13: memref<8x128xf32, #tpu.memory_space<vmem>>) attributes {dimension_semantics = [#tpu.dimension_semantics<parallel>], iteration_bounds = array<i64: 2>, scalar_prefetch = 0 : i64, scratch_operands = 1 : i64, tpu.core_type = #tpu.core_type<tc>, window_params = [{transform_indices = @transform_0, window_bounds = array<i64: 1, 1, 2048>}, {transform_indices = @transform_1, window_bounds = array<i64: 1, 16, 128>}, {pipeline_mode = #tpu.pipeline_mode<synchronous>, transform_indices = @transform_2, window_bounds = array<i64: 2048, 128>}, {pipeline_mode = #tpu.pipeline_mode<synchronous>, transform_indices = @transform_3, window_bounds = array<i64: 1, 128>}, {pipeline_mode = #tpu.pipeline_mode<synchronous>, transform_indices = @transform_4, window_bounds = array<i64: 128, 128>}, {pipeline_mode = #tpu.pipeline_mode<synchronous>, transform_indices = @transform_5, window_bounds = array<i64: 1, 128>}, {pipeline_mode = #tpu.pipeline_mode<synchronous>, transform_indices = @transform_6, window_bounds = array<i64: 128, 128>}, {pipeline_mode = #tpu.pipeline_mode<synchronous>, transform_indices = @transform_7, window_bounds = array<i64: 1, 128>}, {pipeline_mode = #tpu.pipeline_mode<synchronous>, transform_indices = @transform_8, window_bounds = array<i64: 128, 128>}, {pipeline_mode = #tpu.pipeline_mode<synchronous>, transform_indices = @transform_9, window_bounds = array<i64: 1, 128>}, {transform_indices = @transform_10, window_bounds = array<i64: 1, 1, 128>}, {transform_indices = @transform_11, window_bounds = array<i64: 1, 8, 128>}]} {
    %c0 = arith.constant 0 : index
    %c0_0 = arith.constant 0 : index
    %c0_1 = arith.constant 0 : index
    %0 = vector.load %arg1[%c0, %c0_0, %c0_1] : memref<1x1x2048xf32, #tpu.memory_space<vmem>>, vector<1x1x2048xf32>
    %1 = vector.shape_cast %0 : vector<1x1x2048xf32> to vector<1x2048xf32>
    %2 = arith.truncf %1 : vector<1x2048xf32> to vector<1x2048xbf16>
    %c0_2 = arith.constant 0 : index
    %c0_3 = arith.constant 0 : index
    %3 = vector.load %arg3[%c0_2, %c0_3] : memref<2048x128xf32, #tpu.memory_space<vmem>>, vector<2048x128xf32>
    %4 = arith.truncf %3 : vector<2048x128xf32> to vector<2048x128xbf16>
    %cst = arith.constant dense<0.000000e+00> : vector<1x128xf32>
    %5 = tpu.matmul %2, %4, %cst {dimension_numbers = #tpu.dot_dimension_numbers<[1], [0], [0], [1], [0, 0, 1, 1], [], []>} : vector<1x2048xbf16>, vector<2048x128xbf16>, vector<1x128xf32> -> vector<1x128xf32>
    %c0_4 = arith.constant 0 : index
    %c0_5 = arith.constant 0 : index
    %6 = vector.load %arg4[%c0_4, %c0_5] : memref<1x128xf32, #tpu.memory_space<vmem>>, vector<1x128xf32>
    %7 = arith.addf %5, %6 : vector<1x128xf32>
    %c0_6 = arith.constant 0 : index
    %c0_7 = arith.constant 0 : index
    %c0_8 = arith.constant 0 : index
    %8 = vector.load %arg11[%c0_6, %c0_7, %c0_8] : memref<1x1x128xf32, #tpu.memory_space<vmem>>, vector<1x1x128xf32>
    %9 = vector.shape_cast %8 : vector<1x1x128xf32> to vector<1x128xf32>
    %10 = vector.shape_cast %7 : vector<1x128xf32> to vector<1x1x128xf32>
    tpu.vector_store %arg11[%c0_6, %c0_7, %c0_8], %10 {strides = array<i32>} : memref<1x1x128xf32, #tpu.memory_space<vmem>>, vector<1x1x128xf32>,
    %cst_9 = arith.constant 0.000000e+00 : f32
    %11 = vector.broadcast %cst_9 : f32 to vector<8x128xf32>
    %c0_10 = arith.constant 0 : index
    %c0_11 = arith.constant 0 : index
    %12 = vector.load %arg13[%c0_10, %c0_11] : memref<8x128xf32, #tpu.memory_space<vmem>>, vector<8x128xf32>
    tpu.vector_store %arg13[%c0_10, %c0_11], %11 {strides = array<i32>} : memref<8x128xf32, #tpu.memory_space<vmem>>, vector<8x128xf32>,
    %13 = vector.extract_strided_slice %7 {offsets = [0, 0], sizes = [1, 4], strides = [1, 1]} : vector<1x128xf32> to vector<1x4xf32>
    %c0_12 = arith.constant 0 : index
    %c0_13 = arith.constant 0 : index
    %14 = vector.load %arg13[%c0_12, %c0_13] : memref<8x128xf32, #tpu.memory_space<vmem>>, vector<1x4xf32>
    tpu.vector_store %arg13[%c0_12, %c0_13], %13 {strides = array<i32>} : memref<8x128xf32, #tpu.memory_space<vmem>>, vector<1x4xf32>,
    %15 = vector.extract_strided_slice %7 {offsets = [0, 4], sizes = [1, 4], strides = [1, 1]} : vector<1x128xf32> to vector<1x4xf32>
    %c1 = arith.constant 1 : index
    %c0_14 = arith.constant 0 : index
    %16 = vector.load %arg13[%c1, %c0_14] : memref<8x128xf32, #tpu.memory_space<vmem>>, vector<1x4xf32>
    tpu.vector_store %arg13[%c1, %c0_14], %15 {strides = array<i32>} : memref<8x128xf32, #tpu.memory_space<vmem>>, vector<1x4xf32>,
    %17 = vector.extract_strided_slice %7 {offsets = [0, 8], sizes = [1, 4], strides = [1, 1]} : vector<1x128xf32> to vector<1x4xf32>
    %c2 = arith.constant 2 : index
    %c0_15 = arith.constant 0 : index
    %18 = vector.load %arg13[%c2, %c0_15] : memref<8x128xf32, #tpu.memory_space<vmem>>, vector<1x4xf32>
    tpu.vector_store %arg13[%c2, %c0_15], %17 {strides = array<i32>} : memref<8x128xf32, #tpu.memory_space<vmem>>, vector<1x4xf32>,
    %19 = vector.extract_strided_slice %7 {offsets = [0, 12], sizes = [1, 4], strides = [1, 1]} : vector<1x128xf32> to vector<1x4xf32>
    %c3 = arith.constant 3 : index
    %c0_16 = arith.constant 0 : index
    %20 = vector.load %arg13[%c3, %c0_16] : memref<8x128xf32, #tpu.memory_space<vmem>>, vector<1x4xf32>
    tpu.vector_store %arg13[%c3, %c0_16], %19 {strides = array<i32>} : memref<8x128xf32, #tpu.memory_space<vmem>>, vector<1x4xf32>,
    %21 = vector.extract_strided_slice %7 {offsets = [0, 16], sizes = [1, 4], strides = [1, 1]} : vector<1x128xf32> to vector<1x4xf32>
    %c4 = arith.constant 4 : index
    %c0_17 = arith.constant 0 : index
    %22 = vector.load %arg13[%c4, %c0_17] : memref<8x128xf32, #tpu.memory_space<vmem>>, vector<1x4xf32>
    tpu.vector_store %arg13[%c4, %c0_17], %21 {strides = array<i32>} : memref<8x128xf32, #tpu.memory_space<vmem>>, vector<1x4xf32>,
    %23 = vector.extract_strided_slice %7 {offsets = [0, 20], sizes = [1, 4], strides = [1, 1]} : vector<1x128xf32> to vector<1x4xf32>
    %c5 = arith.constant 5 : index
    %c0_18 = arith.constant 0 : index
    %24 = vector.load %arg13[%c5, %c0_18] : memref<8x128xf32, #tpu.memory_space<vmem>>, vector<1x4xf32>
    tpu.vector_store %arg13[%c5, %c0_18], %23 {strides = array<i32>} : memref<8x128xf32, #tpu.memory_space<vmem>>, vector<1x4xf32>,
    %25 = vector.extract_strided_slice %7 {offsets = [0, 24], sizes = [1, 4], strides = [1, 1]} : vector<1x128xf32> to vector<1x4xf32>
    %c6 = arith.constant 6 : index
    %c0_19 = arith.constant 0 : index
    %26 = vector.load %arg13[%c6, %c0_19] : memref<8x128xf32, #tpu.memory_space<vmem>>, vector<1x4xf32>
    tpu.vector_store %arg13[%c6, %c0_19], %25 {strides = array<i32>} : memref<8x128xf32, #tpu.memory_space<vmem>>, vector<1x4xf32>,
    %27 = vector.extract_strided_slice %7 {offsets = [0, 28], sizes = [1, 4], strides = [1, 1]} : vector<1x128xf32> to vector<1x4xf32>
    %c7 = arith.constant 7 : index
    %c0_20 = arith.constant 0 : index
    %28 = vector.load %arg13[%c7, %c0_20] : memref<8x128xf32, #tpu.memory_space<vmem>>, vector<1x4xf32>
    tpu.vector_store %arg13[%c7, %c0_20], %27 {strides = array<i32>} : memref<8x128xf32, #tpu.memory_space<vmem>>, vector<1x4xf32>,
    %c0_21 = arith.constant 0 : index
    %c0_22 = arith.constant 0 : index
    %29 = vector.load %arg13[%c0_21, %c0_22] : memref<8x128xf32, #tpu.memory_space<vmem>>, vector<8x128xf32>
    %c0_23 = arith.constant 0 : index
    %c0_24 = arith.constant 0 : index
    %c0_25 = arith.constant 0 : index
    %30 = vector.load %arg2[%c0_23, %c0_24, %c0_25] : memref<1x16x128xf32, #tpu.memory_space<vmem>>, vector<1x16x128xf32>
    %31 = vector.shape_cast %30 : vector<1x16x128xf32> to vector<16x128xf32>
    %c0_26 = arith.constant 0 : index
    %c0_27 = arith.constant 0 : index
    %32 = vector.load %arg5[%c0_26, %c0_27] : memref<128x128xf32, #tpu.memory_space<vmem>>, vector<128x128xf32>
    %cst_28 = arith.constant dense<0.000000e+00> : vector<8x128xf32>
    %33 = tpu.matmul %29, %32, %cst_28 {dimension_numbers = #tpu.dot_dimension_numbers<[1], [0], [0], [1], [0, 0, 1, 1], [], []>} : vector<8x128xf32>, vector<128x128xf32>, vector<8x128xf32> -> vector<8x128xf32>
    %c0_29 = arith.constant 0 : index
    %c0_30 = arith.constant 0 : index
    %34 = vector.load %arg6[%c0_29, %c0_30] : memref<1x128xf32, #tpu.memory_space<vmem>>, vector<1x128xf32>
    %35 = vector.broadcast %34 : vector<1x128xf32> to vector<8x128xf32>
    %36 = arith.addf %33, %35 : vector<8x128xf32>
    %cst_31 = arith.constant dense<0.000000e+00> : vector<8x16xf32>
    %37 = tpu.matmul %36, %31, %cst_31 {dimension_numbers = #tpu.dot_dimension_numbers<[1], [1], [0], [0], [0, 0, 1, 0], [], []>} : vector<8x128xf32>, vector<16x128xf32>, vector<8x16xf32> -> vector<8x16xf32>
    %cst_32 = arith.constant 0.176776692 : f32
    %38 = vector.broadcast %cst_32 : f32 to vector<8x16xf32>
    %39 = arith.mulf %37, %38 : vector<8x16xf32>
    %cst_33 = arith.constant dense<0xFF800000> : vector<8xf32>
    %40 = vector.multi_reduction <maximumf>, %39, %cst_33 [1] : vector<8x16xf32> to vector<8xf32>
    %41 = vector.shape_cast %40 : vector<8xf32> to vector<8x1xf32>
    %42 = vector.broadcast %41 : vector<8x1xf32> to vector<8x16xf32>
    %43 = arith.subf %39, %42 : vector<8x16xf32>
    %44 = math.exp %43 : vector<8x16xf32>
    %cst_34 = arith.constant dense<0.000000e+00> : vector<8xf32>
    %45 = vector.multi_reduction <add>, %44, %cst_34 [1] : vector<8x16xf32> to vector<8xf32>
    %46 = vector.shape_cast %45 : vector<8xf32> to vector<8x1xf32>
    %47 = tpu.reciprocal %46 {approx = true} : vector<8x1xf32> -> vector<8x1xf32>
    %48 = vector.broadcast %47 : vector<8x1xf32> to vector<8x16xf32>
    %49 = arith.mulf %44, %48 : vector<8x16xf32>
    %cst_35 = arith.constant dense<0.000000e+00> : vector<8x128xf32>
    %50 = tpu.matmul %49, %31, %cst_35 {dimension_numbers = #tpu.dot_dimension_numbers<[1], [0], [0], [1], [0, 0, 1, 1], [], []>} : vector<8x16xf32>, vector<16x128xf32>, vector<8x128xf32> -> vector<8x128xf32>
    %c0_36 = arith.constant 0 : index
    %c0_37 = arith.constant 0 : index
    %51 = vector.load %arg7[%c0_36, %c0_37] : memref<128x128xf32, #tpu.memory_space<vmem>>, vector<128x128xf32>
    %cst_38 = arith.constant dense<0.000000e+00> : vector<8x128xf32>
    %52 = tpu.matmul %50, %51, %cst_38 {dimension_numbers = #tpu.dot_dimension_numbers<[1], [0], [0], [1], [0, 0, 1, 1], [], []>} : vector<8x128xf32>, vector<128x128xf32>, vector<8x128xf32> -> vector<8x128xf32>
    %c0_39 = arith.constant 0 : index
    %c0_40 = arith.constant 0 : index
    %53 = vector.load %arg8[%c0_39, %c0_40] : memref<1x128xf32, #tpu.memory_space<vmem>>, vector<1x128xf32>
    %54 = vector.broadcast %53 : vector<1x128xf32> to vector<8x128xf32>
    %55 = arith.addf %52, %54 : vector<8x128xf32>
    %cst_41 = arith.constant 0.000000e+00 : f32
    %56 = vector.broadcast %cst_41 : f32 to vector<8x128xf32>
    %57 = arith.maximumf %55, %56 : vector<8x128xf32>
    %c0_42 = arith.constant 0 : index
    %c0_43 = arith.constant 0 : index
    %58 = vector.load %arg9[%c0_42, %c0_43] : memref<128x128xf32, #tpu.memory_space<vmem>>, vector<128x128xf32>
    %cst_44 = arith.constant dense<0.000000e+00> : vector<8x128xf32>
    %59 = tpu.matmul %57, %58, %cst_44 {dimension_numbers = #tpu.dot_dimension_numbers<[1], [0], [0], [1], [0, 0, 1, 1], [], []>} : vector<8x128xf32>, vector<128x128xf32>, vector<8x128xf32> -> vector<8x128xf32>
    %c0_45 = arith.constant 0 : index
    %c0_46 = arith.constant 0 : index
    %60 = vector.load %arg10[%c0_45, %c0_46] : memref<1x128xf32, #tpu.memory_space<vmem>>, vector<1x128xf32>
    %61 = vector.broadcast %60 : vector<1x128xf32> to vector<8x128xf32>
    %62 = arith.addf %59, %61 : vector<8x128xf32>
    %63 = arith.addf %62, %29 : vector<8x128xf32>
    %c0_47 = arith.constant 0 : index
    %c0_48 = arith.constant 0 : index
    %c0_49 = arith.constant 0 : index
    %64 = vector.load %arg12[%c0_47, %c0_48, %c0_49] : memref<1x8x128xf32, #tpu.memory_space<vmem>>, vector<1x8x128xf32>
    %65 = vector.shape_cast %64 : vector<1x8x128xf32> to vector<8x128xf32>
    %66 = vector.shape_cast %63 : vector<8x128xf32> to vector<1x8x128xf32>
    tpu.vector_store %arg12[%c0_47, %c0_48, %c0_49], %66 {strides = array<i32>} : memref<1x8x128xf32, #tpu.memory_space<vmem>>, vector<1x8x128xf32>,
    return
  }
  func.func @transform_0(%arg0: i32) -> (i32, i32, i32) {
    %c0_i32 = arith.constant 0 : i32
    %c0_i32_0 = arith.constant 0 : i32
    %c0_i32_1 = arith.constant 0 : i32
    return %arg0, %c0_i32, %c0_i32_0 : i32, i32, i32
  }
  func.func @transform_1(%arg0: i32) -> (i32, i32, i32) {
    %c0_i32 = arith.constant 0 : i32
    %c0_i32_0 = arith.constant 0 : i32
    %c0_i32_1 = arith.constant 0 : i32
    return %arg0, %c0_i32, %c0_i32_0 : i32, i32, i32
  }
  func.func @transform_2(%arg0: i32) -> (i32, i32) {
    %c0_i32 = arith.constant 0 : i32
    %c0_i32_0 = arith.constant 0 : i32
    %c0_i32_1 = arith.constant 0 : i32
    return %c0_i32, %c0_i32_0 : i32, i32
  }
  func.func @transform_3(%arg0: i32) -> (i32, i32) {
    %c0_i32 = arith.constant 0 : i32
    %c0_i32_0 = arith.constant 0 : i32
    %c0_i32_1 = arith.constant 0 : i32
    return %c0_i32, %c0_i32_0 : i32, i32
  }
  func.func @transform_4(%arg0: i32) -> (i32, i32) {
    %c0_i32 = arith.constant 0 : i32
    %c0_i32_0 = arith.constant 0 : i32
    %c0_i32_1 = arith.constant 0 : i32
    return %c0_i32, %c0_i32_0 : i32, i32
  }
  func.func @transform_5(%arg0: i32) -> (i32, i32) {
    %c0_i32 = arith.constant 0 : i32
    %c0_i32_0 = arith.constant 0 : i32
    %c0_i32_1 = arith.constant 0 : i32
    return %c0_i32, %c0_i32_0 : i32, i32
  }
  func.func @transform_6(%arg0: i32) -> (i32, i32) {
    %c0_i32 = arith.constant 0 : i32
    %c0_i32_0 = arith.constant 0 : i32
    %c0_i32_1 = arith.constant 0 : i32
    return %c0_i32, %c0_i32_0 : i32, i32
  }
  func.func @transform_7(%arg0: i32) -> (i32, i32) {
    %c0_i32 = arith.constant 0 : i32
    %c0_i32_0 = arith.constant 0 : i32
    %c0_i32_1 = arith.constant 0 : i32
    return %c0_i32, %c0_i32_0 : i32, i32
  }
  func.func @transform_8(%arg0: i32) -> (i32, i32) {
    %c0_i32 = arith.constant 0 : i32
    %c0_i32_0 = arith.constant 0 : i32
    %c0_i32_1 = arith.constant 0 : i32
    return %c0_i32, %c0_i32_0 : i32, i32
  }
  func.func @transform_9(%arg0: i32) -> (i32, i32) {
    %c0_i32 = arith.constant 0 : i32
    %c0_i32_0 = arith.constant 0 : i32
    %c0_i32_1 = arith.constant 0 : i32
    return %c0_i32, %c0_i32_0 : i32, i32
  }
  func.func @transform_10(%arg0: i32) -> (i32, i32, i32) {
    %c0_i32 = arith.constant 0 : i32
    %c0_i32_0 = arith.constant 0 : i32
    %c0_i32_1 = arith.constant 0 : i32
    return %arg0, %c0_i32, %c0_i32_0 : i32, i32, i32
  }
  func.func @transform_11(%arg0: i32) -> (i32, i32, i32) {
    %c0_i32 = arith.constant 0 : i32
    %c0_i32_0 = arith.constant 0 : i32
    %c0_i32_1 = arith.constant 0 : i32
    return %arg0, %c0_i32, %c0_i32_0 : i32, i32, i32
  }
}

</mosaic_0001>

<bundles_post_ra>
// kernel: two_stage_detector_forward.3
= control target key start
LH: loop header
LB: loop body
LE: loop exit
PB: predicated region body
PF: predicated region fallthrough
CT: control target
= control target key end

     0   :  { %s538_s1 = inlined_call_operand.vmem [shape: f32[128,128], index: 1, kind: input, shape index: {}]   ;;  %s539_s0 = inlined_call_operand.vmem [shape: f32[128,128], index: 0, kind: input, shape index: {}]   ;;  %s540_s2 = inlined_call_operand.vmem [shape: f32[1,128], index: 2, kind: input, shape index: {}]   ;;  %s541_s3 = inlined_call_operand.vmem [shape: f32[128,128], index: 3, kind: output, shape index: {}]  }
   0x1   :  { %v75_v0 = vld [vmem:[%s538_s1] sm:$0xff]  ;;  %v76_v1 = vld [vmem:[%s538_s1 + $0x8] sm:$0xff]  ;;  %v77_v2 = vld [vmem:[%s538_s1 + $0x10] sm:$0xff] }
   0x2   :  { %v91_v3 = vpack.c.bf16 %v76_v1, %v75_v0  ;;  %v78_v4 = vld [vmem:[%s538_s1 + $0x18] sm:$0xff]  ;;  %v79_v6 = vld [vmem:[%s538_s1 + $0x20] sm:$0xff]  ;;  %v80_v7 = vld [vmem:[%s538_s1 + $0x28] sm:$0xff] }
   0x3   :  { %v92_v5 = vpack.c.bf16 %v78_v4, %v77_v2  ;;  %v93_v8 = vpack.c.bf16 %v80_v7, %v79_v6  ;;  %v81_v9 = vld [vmem:[%s538_s1 + $0x30] sm:$0xff]  ;;  %v51_v10 = vld [vmem:[%s539_s0] sm:$0xff]  ;;  %v52_v11 = vld [vmem:[%s539_s0 + $0x8] sm:$0xff] }
   0x4   :  { %323 = vmatprep.subr.bf16.mxu0 %v91_v3  ;;  %355 = vmatprep.subr.bf16.mxu1 %v91_v3  ;;  %v82_v12 = vld [vmem:[%s538_s1 + $0x38] sm:$0xff]  ;;  %v67_v13 = vpack.c.bf16 %v52_v11, %v51_v10  ;;  %v59_v14 = vld [vmem:[%s539_s0 + $0x40] sm:$0xff]  ;;  %v60_v15 = vld [vmem:[%s539_s0 + $0x48] sm:$0xff] }
   0x5   :  { %324 = vmatpush3.bf16.msra.mxu0 %v91_v3  ;;  %363 = vmatpush3.bf16.msra.mxu1 %v91_v3  ;;  %v71_v16 = vpack.c.bf16 %v60_v15, %v59_v14  ;;  %v94_v17 = vpack.c.bf16 %v82_v12, %v81_v9  ;;  %v83_v18 = vld [vmem:[%s538_s1 + $0x40] sm:$0xff]  ;;  %v84_v19 = vld [vmem:[%s538_s1 + $0x48] sm:$0xff]  ;;  %v85_v21 = vld [vmem:[%s538_s1 + $0x50] sm:$0xff] }
   0x6   :  { %325 = vmatprep.subr.bf16.mxu0 %v92_v5  ;;  %356 = vmatprep.subr.bf16.mxu1 %v92_v5  ;;  %v95_v20 = vpack.c.bf16 %v84_v19, %v83_v18  ;;  %v86_v22 = vld [vmem:[%s538_s1 + $0x58] sm:$0xff]  ;;  %v87_v24 = vld [vmem:[%s538_s1 + $0x60] sm:$0xff]  ;;  %v88_v25 = vld [vmem:[%s538_s1 + $0x68] sm:$0xff] }
   0x7   :  { %339 = vmatprep.mubr.bf16.mxu0 %v67_v13  ;;  %347 = vmatprep.mubr.bf16.mxu1 %v71_v16  ;;  %v96_v23 = vpack.c.bf16 %v86_v22, %v85_v21  ;;  %v97_v26 = vpack.c.bf16 %v88_v25, %v87_v24  ;;  %v89_v27 = vld [vmem:[%s538_s1 + $0x70] sm:$0xff]  ;;  %v90_v28 = vld [vmem:[%s538_s1 + $0x78] sm:$0xff]  ;;  %v55_v34 = vld [vmem:[%s539_s0 + $0x20] sm:$0xff] }
   0x8   :  { %v98_v29 = vpack.c.bf16 %v90_v28, %v89_v27  ;;  %v53_v30 = vld [vmem:[%s539_s0 + $0x10] sm:$0xff]  ;;  %v54_v31 = vld [vmem:[%s539_s0 + $0x18] sm:$0xff]  ;;  %v56_v35 = vld [vmem:[%s539_s0 + $0x28] sm:$0xff] }
   0x9   :  { %326 = vmatpush3.bf16.msra.mxu0 %v92_v5  ;;  %364 = vmatpush3.bf16.msra.mxu1 %v92_v5  ;;  %v61_v32 = vld [vmem:[%s539_s0 + $0x50] sm:$0xff]  ;;  %v62_v33 = vld [vmem:[%s539_s0 + $0x58] sm:$0xff]  ;;  %v63_v36 = vld [vmem:[%s539_s0 + $0x60] sm:$0xff]  ;;  %v68_v38 = vpack.c.bf16 %v54_v31, %v53_v30  ;;  %v69_v40 = vpack.c.bf16 %v56_v35, %v55_v34 }
   0xa   :  { %327 = vmatprep.subr.bf16.mxu0 %v93_v8  ;;  %357 = vmatprep.subr.bf16.mxu1 %v93_v8  ;;  %v64_v37 = vld [vmem:[%s539_s0 + $0x68] sm:$0xff]  ;;  %v72_v39 = vpack.c.bf16 %v62_v33, %v61_v32  ;;  %v57_v42 = vld [vmem:[%s539_s0 + $0x30] sm:$0xff]  ;;  %v58_v43 = vld [vmem:[%s539_s0 + $0x38] sm:$0xff] }
   0xb   :  { %v73_v41 = vpack.c.bf16 %v64_v37, %v63_v36  ;;  %v65_v44 = vld [vmem:[%s539_s0 + $0x70] sm:$0xff]  ;;  %v66_v45 = vld [vmem:[%s539_s0 + $0x78] sm:$0xff]  ;;  %v70_v46 = vpack.c.bf16 %v58_v43, %v57_v42  ;;  %v306_v48 = vld [vmem:[%s540_s2] ss:$0 sm:$0xff] }
   0xc   :  { %v74_v47 = vpack.c.bf16 %v66_v45, %v65_v44 }
   0xd   :  { %328 = vmatpush3.bf16.msra.mxu0 %v93_v8  ;;  %365 = vmatpush3.bf16.msra.mxu1 %v93_v8 }
   0xe   :  { %329 = vmatprep.subr.bf16.mxu0 %v94_v17  ;;  %358 = vmatprep.subr.bf16.mxu1 %v94_v17 }
  0x11   :  { %330 = vmatpush3.bf16.msra.mxu0 %v94_v17  ;;  %366 = vmatpush3.bf16.msra.mxu1 %v94_v17 }
  0x12   :  { %331 = vmatprep.subr.bf16.mxu0 %v95_v20  ;;  %359 = vmatprep.subr.bf16.mxu1 %v95_v20 }
  0x15   :  { %332 = vmatpush3.bf16.msra.mxu0 %v95_v20  ;;  %367 = vmatpush3.bf16.msra.mxu1 %v95_v20 }
  0x16   :  { %333 = vmatprep.subr.bf16.mxu0 %v96_v23  ;;  %360 = vmatprep.subr.bf16.mxu1 %v96_v23 }
  0x19   :  { %334 = vmatpush3.bf16.msra.mxu0 %v96_v23  ;;  %368 = vmatpush3.bf16.msra.mxu1 %v96_v23 }
  0x1a   :  { %335 = vmatprep.subr.bf16.mxu0 %v97_v26  ;;  %361 = vmatprep.subr.bf16.mxu1 %v97_v26 }
  0x1d   :  { %336 = vmatpush3.bf16.msra.mxu0 %v97_v26  ;;  %369 = vmatpush3.bf16.msra.mxu1 %v97_v26 }
  0x1e   :  { %337 = vmatprep.subr.bf16.mxu0 %v98_v29  ;;  %362 = vmatprep.subr.bf16.mxu1 %v98_v29 }
  0x21   :  { %338 = vmatpush3.bf16.msra.mxu0 %v98_v29  ;;  %370 = vmatpush3.bf16.msra.mxu1 %v98_v29 }
  0x24   :  { %340 = vmatmul.mubr.bf16.vlgmr.msra.gmra.mrb[0].mxu0 %v68_v38  ;;  %348 = vmatmul.mubr.bf16.vlgmr.msra.gmra.mrb[0].mxu1 %v72_v39 }
  0x25   :  { %343 = vmatprep.mubr.bf16.mxu0 %v69_v40  ;;  %351 = vmatprep.mubr.bf16.mxu1 %v73_v41 }
  0x2c   :  { %344 = vmatmul.mubr.bf16.gmra.mrb[4].mxu0 %v70_v46  ;;  %352 = vmatmul.mubr.bf16.gmra.mrb[4].mxu1 %v74_v47 }
  0xf7   :  { %v341_v49 = vpop.f32.mrb[0].mxu0  ;;  %v349_v50 = vpop.f32.mrb[0].mxu1 }
  0xf8   :  { %v256_v51 = vadd.f32 %v341_v49, %v306_v48  ;;  %v264_v52 = vadd.f32 %v349_v50, %v306_v48  ;;  %v133_v53 = vpop.f32.mrb[1].mxu0  ;;  %v165_v54 = vpop.f32.mrb[1].mxu1 }
  0xf9   :  { %v254_v55 = vadd.f32 %v306_v48, %v133_v53  ;;  %v262_v56 = vadd.f32 %v306_v48, %v165_v54  ;;  %v342_v57 = vpop.f32.mrb[2].mxu0  ;;  %v350_v58 = vpop.f32.mrb[2].mxu1 }
  0xfa   :  { %v272_v59 = vmax.f32 %v256_v51, 0.0  ;;  %v280_v60 = vmax.f32 %v264_v52, 0.0  ;;  %v257_v61 = vadd.f32 %v342_v57, %v306_v48  ;;  %v265_v62 = vadd.f32 %v350_v58, %v306_v48  ;;  %v136_v63 = vpop.f32.mrb[3].mxu0  ;;  %v168_v0 = vpop.f32.mrb[3].mxu1 }
  0xfb   :  { %v270_v1 = vmax.f32 %v254_v55, 0.0  ;;  %v278_v2 = vmax.f32 %v262_v56, 0.0  ;;  %v255_v3 = vadd.f32 %v306_v48, %v136_v63  ;;  %v263_v4 = vadd.f32 %v306_v48, %v168_v0 }
  0xfc   :  { %288 = vst [vmem:[%s541_s3 + $0x10] sm:$0xff] %v272_v59  ;;  %296 = vst [vmem:[%s541_s3 + $0x50] sm:$0xff] %v280_v60  ;;  %v273_v5 = vmax.f32 %v257_v61, 0.0  ;;  %v281_v6 = vmax.f32 %v265_v62, 0.0 }
  0xfd   :  { %286 = vst [vmem:[%s541_s3] sm:$0xff] %v270_v1  ;;  %294 = vst [vmem:[%s541_s3 + $0x40] sm:$0xff] %v278_v2  ;;  %v271_v7 = vmax.f32 %v255_v3, 0.0  ;;  %v279_v8 = vmax.f32 %v263_v4, 0.0 }
  0xfe   :  { %289 = vst [vmem:[%s541_s3 + $0x18] sm:$0xff] %v273_v5  ;;  %297 = vst [vmem:[%s541_s3 + $0x58] sm:$0xff] %v281_v6 }
  0xff   :  { %287 = vst [vmem:[%s541_s3 + $0x8] sm:$0xff] %v271_v7  ;;  %295 = vst [vmem:[%s541_s3 + $0x48] sm:$0xff] %v279_v8  ;;  %v345_v9 = vpop.f32.mrb[4].mxu0  ;;  %v353_v10 = vpop.f32.mrb[4].mxu1 }
 0x100   :  { %v260_v11 = vadd.f32 %v345_v9, %v306_v48  ;;  %v268_v12 = vadd.f32 %v353_v10, %v306_v48  ;;  %v149_v13 = vpop.f32.mrb[5].mxu0  ;;  %v181_v14 = vpop.f32.mrb[5].mxu1 }
 0x101   :  { %v258_v15 = vadd.f32 %v306_v48, %v149_v13  ;;  %v266_v16 = vadd.f32 %v306_v48, %v181_v14  ;;  %v346_v17 = vpop.f32.mrb[6].mxu0  ;;  %v354_v18 = vpop.f32.mrb[6].mxu1 }
 0x102   :  { %v276_v19 = vmax.f32 %v260_v11, 0.0  ;;  %v284_v20 = vmax.f32 %v268_v12, 0.0  ;;  %v261_v21 = vadd.f32 %v346_v17, %v306_v48  ;;  %v269_v22 = vadd.f32 %v354_v18, %v306_v48  ;;  %v152_v23 = vpop.f32.mrb[7].mxu0  ;;  %v184_v24 = vpop.f32.mrb[7].mxu1 }
 0x103   :  { %v274_v25 = vmax.f32 %v258_v15, 0.0  ;;  %v282_v26 = vmax.f32 %v266_v16, 0.0  ;;  %v259_v27 = vadd.f32 %v306_v48, %v152_v23  ;;  %v267_v28 = vadd.f32 %v306_v48, %v184_v24 }
 0x104   :  { %292 = vst [vmem:[%s541_s3 + $0x30] sm:$0xff] %v276_v19  ;;  %300 = vst [vmem:[%s541_s3 + $0x70] sm:$0xff] %v284_v20  ;;  %v277_v29 = vmax.f32 %v261_v21, 0.0  ;;  %v285_v30 = vmax.f32 %v269_v22, 0.0 }
 0x105   :  { %290 = vst [vmem:[%s541_s3 + $0x20] sm:$0xff] %v274_v25  ;;  %298 = vst [vmem:[%s541_s3 + $0x60] sm:$0xff] %v282_v26  ;;  %v275_v31 = vmax.f32 %v259_v27, 0.0  ;;  %v283_v32 = vmax.f32 %v267_v28, 0.0 }
 0x106   :  { %293 = vst [vmem:[%s541_s3 + $0x38] sm:$0xff] %v277_v29  ;;  %301 = vst [vmem:[%s541_s3 + $0x78] sm:$0xff] %v285_v30 }
 0x107   :  { %291 = vst [vmem:[%s541_s3 + $0x28] sm:$0xff] %v275_v31  ;;  %299 = vst [vmem:[%s541_s3 + $0x68] sm:$0xff] %v283_v32 }

// kernel: two_stage_detector_forward.4
= control target key start
LH: loop header
LB: loop body
LE: loop exit
PB: predicated region body
PF: predicated region fallthrough
CT: control target
= control target key end

     0   :  { %s864_s18 = smov 0   ;;  %s866_s19 = smov 0   ;;  %s1087_s0 = inlined_call_operand.vmem [shape: f32[32,1536], index: 0, kind: input, shape index: {}]   ;;  %s1088_s1 = inlined_call_operand.vmem [shape: f32[1536,128], index: 1, kind: input, shape index: {}]   ;;  %s1089_s2 = inlined_call_operand.vmem [shape: f32[1,128], index: 2, kind: input, shape index: {}]   ;;  %s1090_s3 = inlined_call_operand.vmem [shape: f32[128,128], index: 3, kind: input, shape index: {}]   ;;  %s1091_s4 = inlined_call_operand.vmem [shape: f32[1,128], index: 4, kind: input, shape index: {}]   ;;  %s1092_s5 = inlined_call_operand.vmem [shape: f32[32,128], index: 5, kind: output, shape index: {}]  }
   0x1   :  { %s868_s20 = smov 0  }
   0x2 LB: > { %s880_s21 = sadd.s32 4294967295, %s831_s20   ;;  %s883_s22 = sadd.s32 1, %s831_s20   ;;  %s831_s20 = sphi %s868_s20, %s1095_s20   ;;  %s827_s19 = sphi %s866_s19, %s1094_s19   ;;  %s823_s18 = sphi %s864_s18, %s1093_s18  }
   0x3   : > { %s19_s23 = ssub.s32 %s831_s20, %s883_s22  ;;  %s22_s24 = sadd.s32 1, %s827_s19 }
   0x4   : > { %p20_p0 = scmp.eq.s32.totalorder %s19_s23, 0  ;;  %p29_p1 = scmp.ne.s32.totalorder %s827_s19, %s823_s18 }
   0x5   : > { %p30_p2 = scmp.eq.s32.totalorder %s831_s20, 0  ;;  %p683_p4 = scmp.ge.s32.totalorder %s831_s20, 3 }
   0x6   : > { %s892_s25 = scalar_select %p20_p0, %s827_s19, %s22_s24  }
   0x7   : > { %p31_p3 = por %p30_p2, %p29_p1  ;;  %174 = sbr.rel (%p683_p4) target bundleno = 26 (0x1a), region = 28 }
   0xe   : > { %177 = sbr.rel (!%p31_p3) target bundleno = 26 (0x1a), region = 32  ;;  %s179_s26 = sand.u32 (%p31_p3), 1, %s827_s19  }
   0xf   : > { %s697_s27 = sshll.u32 (%p31_p3), %s831_s20, 5  ;;  %s684_s28 = sshll.u32 (%p31_p3), %s179_s26, 7 }
  0x10   : > { %s900_s6 = scalar_lea.vmem (%p31_p3), %s1087_s0, %s697_s27  ;;  %s181_s7 = scalar_lea.vmem (%p31_p3), [#allocation3], %s684_s28 }
  0x11   : > { %v197_v0 = vld [vmem:[%s900_s6] sm:$0xff] (%p31_p3)  ;;  %v199_v1 = vld [vmem:[%s900_s6 + $0x8] sm:$0xff] (%p31_p3)  ;;  %v201_v2 = vld [vmem:[%s900_s6 + $0x10] sm:$0xff] (%p31_p3) }
  0x12   : > { %198 = vst [vmem:[%s181_s7] sm:$0xff] (%p31_p3), %v197_v0  ;;  %200 = vst [vmem:[%s181_s7 + $0x8] sm:$0xff] (%p31_p3), %v199_v1  ;;  %v203_v3 = vld [vmem:[%s900_s6 + $0x18] sm:$0xff] (%p31_p3)  ;;  %v205_v4 = vld [vmem:[%s900_s6 + $0x60] sm:$0xff] (%p31_p3) }
  0x13   : > { %202 = vst [vmem:[%s181_s7 + $0x10] sm:$0xff] (%p31_p3), %v201_v2  ;;  %v207_v5 = vld [vmem:[%s900_s6 + $0x68] sm:$0xff] (%p31_p3)  ;;  %204 = vst [vmem:[%s181_s7 + $0x18] sm:$0xff] (%p31_p3), %v203_v3  ;;  %v209_v6 = vld [vmem:[%s900_s6 + $0x70] sm:$0xff] (%p31_p3) }
  0x14   : > { %206 = vst [vmem:[%s181_s7 + $0x20] sm:$0xff] (%p31_p3), %v205_v4  ;;  %208 = vst [vmem:[%s181_s7 + $0x28] sm:$0xff] (%p31_p3), %v207_v5  ;;  %v211_v7 = vld [vmem:[%s900_s6 + $0x78] sm:$0xff] (%p31_p3)  ;;  %v213_v8 = vld [vmem:[%s900_s6 + $0xc0] sm:$0xff] (%p31_p3) }
  0x15   : > { %210 = vst [vmem:[%s181_s7 + $0x30] sm:$0xff] %v209_v6  ;;  %212 = vst [vmem:[%s181_s7 + $0x38] sm:$0xff] %v211_v7  ;;  %v215_v9 = vld [vmem:[%s900_s6 + $0xc8] sm:$0xff]  ;;  %v217_v10 = vld [vmem:[%s900_s6 + $0xd0] sm:$0xff] }
  0x16   : > { %214 = vst [vmem:[%s181_s7 + $0x40] sm:$0xff] %v213_v8  ;;  %v219_v11 = vld [vmem:[%s900_s6 + $0xd8] sm:$0xff]  ;;  %216 = vst [vmem:[%s181_s7 + $0x48] sm:$0xff] %v215_v9  ;;  %v221_v12 = vld [vmem:[%s900_s6 + $0x120] sm:$0xff] }
  0x17   : > { %218 = vst [vmem:[%s181_s7 + $0x50] sm:$0xff] %v217_v10  ;;  %220 = vst [vmem:[%s181_s7 + $0x58] sm:$0xff] %v219_v11  ;;  %v223_v13 = vld [vmem:[%s900_s6 + $0x128] sm:$0xff]  ;;  %v225_v14 = vld [vmem:[%s900_s6 + $0x130] sm:$0xff] }
  0x18   : > { %222 = vst [vmem:[%s181_s7 + $0x60] sm:$0xff] %v221_v12  ;;  %224 = vst [vmem:[%s181_s7 + $0x68] sm:$0xff] %v223_v13  ;;  %v227_v15 = vld [vmem:[%s900_s6 + $0x138] sm:$0xff] }
  0x19   : > { %226 = vst [vmem:[%s181_s7 + $0x70] sm:$0xff] %v225_v14  ;;  %228 = vst [vmem:[%s181_s7 + $0x78] sm:$0xff] %v227_v15 }
  0x1a PF: > { %p687_p5 = scmp.ge.s32.totalorder %s831_s20, 1  ;;  %p242_p6 = scmp.lt.s32.totalorder %s831_s20, 4 }
  0x1c   : > { %p243_p7 = pnand %p687_p5, %p242_p6 }
  0x1d   : > { %s249_s8 = sand.u32 (!%p243_p7), 1, %s823_s18   ;;  %s689_s9 = sshll.u32 (!%p243_p7), %s880_s21, 6 }
  0x1e   : > { %246 = sbr.rel (%p243_p7) target bundleno = 544 (0x220), region = 59  ;;  %s688_s10 = sshll.u32 (!%p243_p7), %s249_s8, 7 }
  0x1f   : > { %p278_p8 = scmp.lt.s32.totalorder (!%p243_p7), %s689_s9, 191  ;;  %s927_s15 = scalar_lea.vmem (!%p243_p7), [#allocation3], %s688_s10 }
  0x20   : > { %p691_p9 = scmp.ne.s32.totalorder (!%p243_p7), %s880_s21, 0 }
  0x25   : > { %s1097_s9 = smov (!%p278_p8, %s689_s9), 191  ;;  %287 = sbr.rel (%p691_p9) target bundleno = 44 (0x2c), region = 67 }
  0x26   : > { %s690_s11 = sshll.u32 %s1097_s9, 3  ;;  %v833_v16 = vmov (!%p691_p9), 0.0  }
  0x27   : > { %s925_s14 = scalar_lea.vmem %s1088_s1, %s690_s11  ;;  %288 = vst [vmem:[#allocation2] sm:$0xff] (!%p691_p9), %v833_v16  ;;  %289 = vst [vmem:[#allocation2 + $0x8] sm:$0xff] (!%p691_p9), %v833_v16 }
  0x28   : > { %290 = vst [vmem:[#allocation2 + $0x10] sm:$0xff] (!%p691_p9), %v833_v16  ;;  %291 = vst [vmem:[#allocation2 + $0x18] sm:$0xff] (!%p691_p9), %v833_v16 }
  0x2c PF: > { %v336_v17 = vld [vmem:[%s925_s14 + $0x80] sm:$0xff]  ;;  %v337_v18 = vld [vmem:[%s925_s14 + $0x88] sm:$0xff]  ;;  %v338_v28 = vld [vmem:[%s925_s14 + $0x90] sm:$0xff]  ;;  %p692_p10 = scmp.ne.s32.totalorder %s880_s21, 2 }
  0x2d   : > { %v368_v19 = vld [vmem:[%s925_s14 + $0x180] sm:$0xff]  ;;  %v392_v20 = vpack.c.bf16 %v337_v18, %v336_v17  ;;  %v369_v21 = vld [vmem:[%s925_s14 + $0x188] sm:$0xff]  ;;  %v339_v30 = vld [vmem:[%s925_s14 + $0x98] sm:$0xff] }
  0x2e   : > { %v320_v22 = vld [vmem:[%s925_s14] sm:$0xff]  ;;  %v321_v23 = vld [vmem:[%s925_s14 + $0x8] sm:$0xff]  ;;  %v408_v24 = vpack.c.bf16 %v369_v21, %v368_v19  ;;  %v370_v31 = vld [vmem:[%s925_s14 + $0x190] sm:$0xff]  ;;  %v393_v33 = vpack.c.bf16 %v339_v30, %v338_v28 }
  0x2f   : > { %v384_v25 = vpack.c.bf16 %v321_v23, %v320_v22  ;;  %v352_v26 = vld [vmem:[%s925_s14 + $0x100] sm:$0xff]  ;;  %v353_v27 = vld [vmem:[%s925_s14 + $0x108] sm:$0xff]  ;;  %698 = vmatprep.subr.bf16.mxu0 %v392_v20  ;;  %v371_v32 = vld [vmem:[%s925_s14 + $0x198] sm:$0xff] }
  0x30   : > { %v400_v29 = vpack.c.bf16 %v353_v27, %v352_v26  ;;  %726 = vmatprep.subr.bf16.mxu1 %v408_v24  ;;  %v409_v34 = vpack.c.bf16 %v371_v32, %v370_v31  ;;  %v322_v35 = vld [vmem:[%s925_s14 + $0x10] sm:$0xff]  ;;  %v323_v36 = vld [vmem:[%s925_s14 + $0x18] sm:$0xff]  ;;  %v340_v40 = vld [vmem:[%s925_s14 + $0xa0] sm:$0xff] }
  0x31   : > { %699 = vmatpush3.bf16.msra.mxu0 %v384_v25  ;;  %v354_v37 = vld [vmem:[%s925_s14 + $0x110] sm:$0xff]  ;;  %v385_v38 = vpack.c.bf16 %v323_v36, %v322_v35  ;;  %v355_v39 = vld [vmem:[%s925_s14 + $0x118] sm:$0xff]  ;;  %v341_v41 = vld [vmem:[%s925_s14 + $0xa8] sm:$0xff] }
  0x32   : > { %727 = vmatpush3.bf16.msra.mxu1 %v400_v29  ;;  %700 = vmatprep.subr.bf16.mxu0 %v393_v33  ;;  %v401_v42 = vpack.c.bf16 %v355_v39, %v354_v37  ;;  %v394_v43 = vpack.c.bf16 %v341_v41, %v340_v40  ;;  %v372_v44 = vld [vmem:[%s925_s14 + $0x1a0] sm:$0xff]  ;;  %v373_v45 = vld [vmem:[%s925_s14 + $0x1a8] sm:$0xff]  ;;  %v342_v52 = vld [vmem:[%s925_s14 + $0xb0] sm:$0xff] }
  0x33   : > { %728 = vmatprep.subr.bf16.mxu1 %v409_v34  ;;  %v324_v46 = vld [vmem:[%s925_s14 + $0x20] sm:$0xff]  ;;  %v410_v47 = vpack.c.bf16 %v373_v45, %v372_v44  ;;  %v325_v48 = vld [vmem:[%s925_s14 + $0x28] sm:$0xff]  ;;  %v343_v53 = vld [vmem:[%s925_s14 + $0xb8] sm:$0xff] }
  0x34   : > { %v356_v49 = vld [vmem:[%s925_s14 + $0x120] sm:$0xff]  ;;  %v357_v50 = vld [vmem:[%s925_s14 + $0x128] sm:$0xff]  ;;  %v386_v51 = vpack.c.bf16 %v325_v48, %v324_v46  ;;  %v374_v54 = vld [vmem:[%s925_s14 + $0x1b0] sm:$0xff]  ;;  %v395_v56 = vpack.c.bf16 %v343_v53, %v342_v52 }
  0x35   : > { %701 = vmatpush3.bf16.msra.mxu0 %v385_v38  ;;  %v402_v55 = vpack.c.bf16 %v357_v50, %v356_v49  ;;  %v375_v57 = vld [vmem:[%s925_s14 + $0x1b8] sm:$0xff]  ;;  %v326_v58 = vld [vmem:[%s925_s14 + $0x30] sm:$0xff]  ;;  %v344_v63 = vld [vmem:[%s925_s14 + $0xc0] sm:$0xff] }
  0x36   : > { %729 = vmatpush3.bf16.msra.mxu1 %v401_v42  ;;  %702 = vmatprep.subr.bf16.mxu0 %v394_v43  ;;  %v327_v59 = vld [vmem:[%s925_s14 + $0x38] sm:$0xff]  ;;  %v411_v60 = vpack.c.bf16 %v375_v57, %v374_v54  ;;  %v358_v61 = vld [vmem:[%s925_s14 + $0x130] sm:$0xff]  ;;  %v345_v0 = vld [vmem:[%s925_s14 + $0xc8] sm:$0xff] }
  0x37   : > { %730 = vmatprep.subr.bf16.mxu1 %v410_v47  ;;  %v359_v62 = vld [vmem:[%s925_s14 + $0x138] sm:$0xff]  ;;  %v376_v1 = vld [vmem:[%s925_s14 + $0x1c0] sm:$0xff]  ;;  %v377_v2 = vld [vmem:[%s925_s14 + $0x1c8] sm:$0xff]  ;;  %v387_v3 = vpack.c.bf16 %v327_v59, %v326_v58  ;;  %v396_v5 = vpack.c.bf16 %v345_v0, %v344_v63 }
  0x38   : > { %v403_v4 = vpack.c.bf16 %v359_v62, %v358_v61  ;;  %v328_v6 = vld [vmem:[%s925_s14 + $0x40] sm:$0xff]  ;;  %v329_v7 = vld [vmem:[%s925_s14 + $0x48] sm:$0xff]  ;;  %v412_v9 = vpack.c.bf16 %v377_v2, %v376_v1  ;;  %v346_v11 = vld [vmem:[%s925_s14 + $0xd0] sm:$0xff] }
  0x39   : > { %703 = vmatpush3.bf16.msra.mxu0 %v386_v51  ;;  %v360_v8 = vld [vmem:[%s925_s14 + $0x140] sm:$0xff]  ;;  %v361_v10 = vld [vmem:[%s925_s14 + $0x148] sm:$0xff]  ;;  %v347_v12 = vld [vmem:[%s925_s14 + $0xd8] sm:$0xff]  ;;  %v388_v15 = vpack.c.bf16 %v329_v7, %v328_v6 }
  0x3a   : > { %731 = vmatpush3.bf16.msra.mxu1 %v402_v55  ;;  %704 = vmatprep.subr.bf16.mxu0 %v395_v56  ;;  %v378_v13 = vld [vmem:[%s925_s14 + $0x1d0] sm:$0xff]  ;;  %v379_v14 = vld [vmem:[%s925_s14 + $0x1d8] sm:$0xff]  ;;  %v404_v16 = vpack.c.bf16 %v361_v10, %v360_v8  ;;  %v397_v17 = vpack.c.bf16 %v347_v12, %v346_v11  ;;  %v348_v23 = vld [vmem:[%s925_s14 + $0xe0] sm:$0xff] }
  0x3b   : > { %732 = vmatprep.subr.bf16.mxu1 %v411_v60  ;;  %v330_v18 = vld [vmem:[%s925_s14 + $0x50] sm:$0xff]  ;;  %v331_v19 = vld [vmem:[%s925_s14 + $0x58] sm:$0xff]  ;;  %v413_v21 = vpack.c.bf16 %v379_v14, %v378_v13  ;;  %v349_v24 = vld [vmem:[%s925_s14 + $0xe8] sm:$0xff] }
  0x3c   : > { %v362_v20 = vld [vmem:[%s925_s14 + $0x150] sm:$0xff]  ;;  %v363_v22 = vld [vmem:[%s925_s14 + $0x158] sm:$0xff]  ;;  %v380_v25 = vld [vmem:[%s925_s14 + $0x1e0] sm:$0xff]  ;;  %v389_v28 = vpack.c.bf16 %v331_v19, %v330_v18  ;;  %v398_v33 = vpack.c.bf16 %v349_v24, %v348_v23 }
  0x3d   : > { %705 = vmatpush3.bf16.msra.mxu0 %v387_v3  ;;  %v381_v26 = vld [vmem:[%s925_s14 + $0x1e8] sm:$0xff]  ;;  %v332_v27 = vld [vmem:[%s925_s14 + $0x60] sm:$0xff]  ;;  %v405_v32 = vpack.c.bf16 %v363_v22, %v362_v20  ;;  %v350_v34 = vld [vmem:[%s925_s14 + $0xf0] sm:$0xff] }
  0x3e   : > { %733 = vmatpush3.bf16.msra.mxu1 %v403_v4  ;;  %706 = vmatprep.subr.bf16.mxu0 %v396_v5  ;;  %v333_v29 = vld [vmem:[%s925_s14 + $0x68] sm:$0xff]  ;;  %v364_v30 = vld [vmem:[%s925_s14 + $0x160] sm:$0xff]  ;;  %v414_v37 = vpack.c.bf16 %v381_v26, %v380_v25  ;;  %v351_v38 = vld [vmem:[%s925_s14 + $0xf8] sm:$0xff] }
  0x3f   : > { %734 = vmatprep.subr.bf16.mxu1 %v412_v9  ;;  %v365_v31 = vld [vmem:[%s925_s14 + $0x168] sm:$0xff]  ;;  %v299_v40 = vld [vmem:[%s927_s15 + $0x18] sm:$0xff]  ;;  %v382_v42 = vld [vmem:[%s925_s14 + $0x1f0] sm:$0xff]  ;;  %v390_v45 = vpack.c.bf16 %v333_v29, %v332_v27  ;;  %v399_v47 = vpack.c.bf16 %v351_v38, %v350_v34 }
  0x40   : > { %v297_v35 = vld [vmem:[%s927_s15 + $0x8] sm:$0xff]  ;;  %v303_v41 = vld [vmem:[%s927_s15 + $0x38] sm:$0xff]  ;;  %v406_v46 = vpack.c.bf16 %v365_v31, %v364_v30  ;;  %v334_v48 = vld [vmem:[%s925_s14 + $0x70] sm:$0xff] }
  0x41   : > { %707 = vmatpush3.bf16.msra.mxu0 %v388_v15  ;;  %v301_v36 = vld [vmem:[%s927_s15 + $0x28] sm:$0xff]  ;;  %v383_v43 = vld [vmem:[%s925_s14 + $0x1f8] sm:$0xff]  ;;  %v315_v44 = vpack.c.bf16 %v303_v41, %v299_v40  ;;  %v366_v51 = vld [vmem:[%s925_s14 + $0x170] sm:$0xff] }
  0x42   : > { %735 = vmatpush3.bf16.msra.mxu1 %v404_v16  ;;  %708 = vmatprep.subr.bf16.mxu0 %v397_v17  ;;  %v313_v39 = vpack.c.bf16 %v301_v36, %v297_v35  ;;  %v335_v49 = vld [vmem:[%s925_s14 + $0x78] sm:$0xff]  ;;  %v415_v50 = vpack.c.bf16 %v383_v43, %v382_v42  ;;  %v296_v54 = vld [vmem:[%s927_s15] sm:$0xff]  ;;  %v298_v56 = vld [vmem:[%s927_s15 + $0x10] sm:$0xff] }
  0x43   : > { %736 = vmatprep.subr.bf16.mxu1 %v413_v21  ;;  %v367_v52 = vld [vmem:[%s925_s14 + $0x178] sm:$0xff]  ;;  %497 = vmatprep.mubr.bf16.mxu1 %v315_v44  ;;  %v391_v53 = vpack.c.bf16 %v335_v49, %v334_v48  ;;  %v300_v55 = vld [vmem:[%s927_s15 + $0x20] sm:$0xff]  ;;  %v302_v58 = vld [vmem:[%s927_s15 + $0x30] sm:$0xff] }
  0x44   : > { %448 = vmatprep.mubr.bf16.mxu0 %v313_v39  ;;  %v407_v57 = vpack.c.bf16 %v367_v52, %v366_v51  ;;  %v305_v59 = vld [vmem:[%s927_s15 + $0x48] sm:$0xff]  ;;  %v307_v61 = vld [vmem:[%s927_s15 + $0x58] sm:$0xff]  ;;  %v312_v63 = vpack.c.bf16 %v300_v55, %v296_v54  ;;  %v314_v0 = vpack.c.bf16 %v302_v58, %v298_v56  ;;  %v304_v3 = vld [vmem:[%s927_s15 + $0x40] sm:$0xff] }
  0x45   : > { %709 = vmatpush3.bf16.msra.mxu0 %v389_v28  ;;  %v309_v60 = vld [vmem:[%s927_s15 + $0x68] sm:$0xff]  ;;  %v311_v62 = vld [vmem:[%s927_s15 + $0x78] sm:$0xff]  ;;  %v308_v4 = vld [vmem:[%s927_s15 + $0x60] sm:$0xff] }
  0x46   : > { %737 = vmatpush3.bf16.msra.mxu1 %v405_v32  ;;  %710 = vmatprep.subr.bf16.mxu0 %v398_v33  ;;  %v317_v1 = vpack.c.bf16 %v309_v60, %v305_v59  ;;  %v319_v2 = vpack.c.bf16 %v311_v62, %v307_v61  ;;  %v306_v5 = vld [vmem:[%s927_s15 + $0x50] sm:$0xff]  ;;  %v316_v7 = vpack.c.bf16 %v308_v4, %v304_v3  ;;  %v292_v18 = vld [vmem:[#allocation2] sm:$0xff]  ;;  %v293_v23 = vld [vmem:[#allocation2 + $0x8] sm:$0xff] }
  0x47   : > { %738 = vmatprep.subr.bf16.mxu1 %v414_v37  ;;  %v310_v6 = vld [vmem:[%s927_s15 + $0x70] sm:$0xff]  ;;  %v295_v41 = vld [vmem:[#allocation2 + $0x18] sm:$0xff]  ;;  %v551_v51 = vld [vmem:[%s1090_s3 + $0x20] sm:$0xff] (!%p692_p10) }
  0x48   : > { %v318_v8 = vpack.c.bf16 %v310_v6, %v306_v5  ;;  %v294_v36 = vld [vmem:[#allocation2 + $0x10] sm:$0xff]  ;;  %v550_v49 = vld [vmem:[%s1090_s3 + $0x18] sm:$0xff] (!%p692_p10)  ;;  %v552_v52 = vld [vmem:[%s1090_s3 + $0x28] sm:$0xff] (!%p692_p10) }
  0x49   : > { %711 = vmatpush3.bf16.msra.mxu0 %v390_v45  ;;  %v547_v45 = vld [vmem:[%s1090_s3] sm:$0xff] (!%p692_p10)  ;;  %v553_v56 = vld [vmem:[%s1090_s3 + $0x30] sm:$0xff] (!%p692_p10)  ;;  %v558_v5 = vld [vmem:[%s1090_s3 + $0x58] sm:$0xff] (!%p692_p10) }
  0x4a   : > { %739 = vmatpush3.bf16.msra.mxu1 %v406_v46  ;;  %712 = vmatprep.subr.bf16.mxu0 %v399_v47  ;;  %v548_v46 = vld [vmem:[%s1090_s3 + $0x8] sm:$0xff] (!%p692_p10)  ;;  %v549_v47 = vld [vmem:[%s1090_s3 + $0x10] sm:$0xff] (!%p692_p10)  ;;  %v693_v58 = vld [vmem:[%s1089_s2] ss:$0 sm:$0xff] (!%p692_p10) }
  0x4b   : > { %740 = vmatprep.subr.bf16.mxu1 %v415_v50  ;;  %v563_v48 = vpack.c.bf16 (!%p692_p10), %v548_v46, %v547_v45  ;;  %v564_v50 = vpack.c.bf16 (!%p692_p10), %v550_v49, %v549_v47  ;;  %v557_v4 = vld [vmem:[%s1090_s3 + $0x50] sm:$0xff] (!%p692_p10) }
  0x4c   : > { %v568_v6 = vpack.c.bf16 (!%p692_p10), %v558_v5, %v557_v4 }
  0x4d   : > { %713 = vmatpush3.bf16.msra.mxu0 %v391_v53  ;;  %v565_v53 = vpack.c.bf16 (!%p692_p10), %v552_v52, %v551_v51 }
  0x4e   : > { %741 = vmatpush3.bf16.msra.mxu1 %v407_v57  ;;  %764 = vmatprep.subr.bf16.mxu0 (!%p692_p10), %v563_v48  ;;  %v554_v57 = vld [vmem:[%s1090_s3 + $0x38] sm:$0xff] (!%p692_p10) }
  0x4f   : > { %v566_v61 = vpack.c.bf16 (!%p692_p10), %v554_v57, %v553_v56 }
  0x50   : > { %449 = vmatmul.mubr.bf16.vlgmr.msra.gmra.mrb[0].mxu0 %v312_v63 }
  0x51   : > { %498 = vmatmul.mubr.bf16.vlgmr.msra.gmra.mrb[0].mxu1 %v314_v0  ;;  %456 = vmatprep.mubr.bf16.mxu0 %v317_v1  ;;  %v555_v0 = vld [vmem:[%s1090_s3 + $0x40] sm:$0xff] (!%p692_p10)  ;;  %v556_v1 = vld [vmem:[%s1090_s3 + $0x48] sm:$0xff] (!%p692_p10) }
  0x52   : > { %505 = vmatprep.mubr.bf16.mxu1 %v319_v2  ;;  %765 = vmatpush3.bf16.msra.mxu0 (!%p692_p10), %v563_v48  ;;  %v567_v3 = vpack.c.bf16 (!%p692_p10), %v556_v1, %v555_v0 }
  0x53   : > { %766 = vmatprep.subr.bf16.mxu0 (!%p692_p10), %v564_v50 }
  0x56   : > { %767 = vmatpush3.bf16.msra.mxu0 (!%p692_p10), %v564_v50 }
  0x57   : > { %768 = vmatprep.subr.bf16.mxu0 (!%p692_p10), %v565_v53 }
  0x58   : > { %457 = vmatmul.mubr.bf16.gmra.mrb[4].mxu0 %v316_v7  ;;  %v559_v7 = vld [vmem:[%s1090_s3 + $0x60] sm:$0xff] (!%p692_p10) }
  0x59   : > { %506 = vmatmul.mubr.bf16.gmra.mrb[4].mxu1 %v318_v8  ;;  %v560_v8 = vld [vmem:[%s1090_s3 + $0x68] sm:$0xff] (!%p692_p10) }
  0x5a   : > { %769 = vmatpush3.bf16.msra.mxu0 (!%p692_p10), %v565_v53 }
  0x5b   : > { %770 = vmatprep.subr.bf16.mxu0 (!%p692_p10), %v566_v61 }
  0x5e   : > { %771 = vmatpush3.bf16.msra.mxu0 (!%p692_p10), %v566_v61 }
  0x5f   : > { %772 = vmatprep.subr.bf16.mxu0 (!%p692_p10), %v567_v3 }
  0x62   : > { %773 = vmatpush3.bf16.msra.mxu0 (!%p692_p10), %v567_v3 }
  0x63   : > { %774 = vmatprep.subr.bf16.mxu0 (!%p692_p10), %v568_v6 }
  0x66   : > { %775 = vmatpush3.bf16.msra.mxu0 (!%p692_p10), %v568_v6 }
 0x123   : > { %v714_v9 = vpop.f32.mrb[0].mxu0 }
 0x124   : > { %v742_v10 = vpop.f32.mrb[0].mxu1  ;;  %v715_v11 = vpop.f32.mrb[1].mxu0 }
 0x125   : > { %v716_v12 = vadd.f32 %v715_v11, %v714_v9  ;;  %v743_v13 = vpop.f32.mrb[1].mxu1  ;;  %v717_v14 = vpop.f32.mrb[2].mxu0  ;;  %v569_v11 = vpack.c.bf16 (!%p692_p10), %v560_v8, %v559_v7 }
 0x126   : > { %v744_v15 = vadd.f32 %v743_v13, %v742_v10  ;;  %v745_v16 = vpop.f32.mrb[2].mxu1  ;;  %v718_v17 = vpop.f32.mrb[3].mxu0  ;;  %v562_v13 = vld [vmem:[%s1090_s3 + $0x78] sm:$0xff] (!%p692_p10) }
 0x127   : > { %v719_v19 = vadd.f32 %v718_v17, %v717_v14  ;;  %v746_v20 = vpop.f32.mrb[3].mxu1  ;;  %776 = vmatprep.subr.bf16.mxu0 (!%p692_p10), %v569_v11 }
 0x128   : > { %v500_v21 = vadd.f32 %v744_v15, %v716_v12  ;;  %v747_v22 = vadd.f32 %v746_v20, %v745_v16  ;;  %v561_v12 = vld [vmem:[%s1090_s3 + $0x70] sm:$0xff] (!%p692_p10)  ;;  %777 = vmatpush3.bf16.msra.mxu0 (!%p692_p10), %v569_v11  ;;  %v694_v20 = vld [vmem:[%s1091_s4] ss:$0 sm:$0xff] (!%p692_p10) }
 0x129   : > { %v570_v16 = vpack.c.bf16 (!%p692_p10), %v562_v13, %v561_v12 }
 0x12a   : > { %v514_v24 = vadd.f32 %v500_v21, %v292_v18  ;;  %v503_v25 = vadd.f32 %v747_v22, %v719_v19 }
 0x12b   : > { %v720_v26 = vpop.f32.mrb[4].mxu0  ;;  %778 = vmatprep.subr.bf16.mxu0 (!%p692_p10), %v570_v16 }
 0x12c   : > { %518 = vst [vmem:[#allocation2] sm:$0xff] %v514_v24  ;;  %v515_v27 = vadd.f32 %v503_v25, %v293_v23  ;;  %v748_v28 = vpop.f32.mrb[4].mxu1  ;;  %v721_v29 = vpop.f32.mrb[5].mxu0  ;;  %779 = vmatpush3.bf16.msra.mxu0 (!%p692_p10), %v570_v16 }
 0x12d   : > { %v722_v30 = vadd.f32 %v721_v29, %v720_v26  ;;  %v749_v31 = vpop.f32.mrb[5].mxu1  ;;  %v723_v32 = vpop.f32.mrb[6].mxu0 }
 0x12e   : > { %519 = vst [vmem:[#allocation2 + $0x8] sm:$0xff] %v515_v27  ;;  %v750_v33 = vadd.f32 %v749_v31, %v748_v28  ;;  %v751_v34 = vpop.f32.mrb[6].mxu1  ;;  %v724_v35 = vpop.f32.mrb[7].mxu0 }
 0x12f   : > { %v725_v37 = vadd.f32 %v724_v35, %v723_v32  ;;  %v752_v38 = vpop.f32.mrb[7].mxu1 }
 0x130   : > { %v508_v39 = vadd.f32 %v750_v33, %v722_v30  ;;  %v753_v40 = vadd.f32 %v752_v38, %v751_v34  ;;  %525 = sbr.rel (%p692_p10) target bundleno = 544 (0x220), region = 71 }
 0x132   : > { %v516_v42 = vadd.f32 %v508_v39, %v294_v36  ;;  %v511_v43 = vadd.f32 %v753_v40, %v725_v37 }
 0x133   : > { %v526_v54 = vld [vmem:[#allocation2] sm:$0xff] (!%p692_p10) }
 0x134   : > { %520 = vst [vmem:[#allocation2 + $0x10] sm:$0xff] %v516_v42  ;;  %v517_v44 = vadd.f32 %v511_v43, %v295_v41  ;;  %v537_v59 = vadd.f32 (!%p692_p10), %v693_v58, %v526_v54 }
 0x135   : > { %v527_v55 = vld [vmem:[#allocation2 + $0x8] sm:$0xff] (!%p692_p10) }
 0x136   : > { %521 = vst [vmem:[#allocation2 + $0x18] sm:$0xff] %v517_v44  ;;  %v538_v60 = vadd.f32 (!%p692_p10), %v693_v58, %v527_v55  ;;  %v541_v62 = vmax.f32 (!%p692_p10), %v537_v59, 0.0 }
 0x138   : > { %v542_v63 = vmax.f32 %v538_v60, 0.0 }
 0x13a   : > { %v545_v2 = vpack.c.bf16 %v542_v63, %v541_v62 }
 0x13b   : > { %v528_v9 = vld [vmem:[#allocation2 + $0x10] sm:$0xff] }
 0x13c   : > { %780 = vmatprep.mubr.bf16.mxu0 %v545_v2  ;;  %v539_v14 = vadd.f32 %v693_v58, %v528_v9 }
 0x13d   : > { %v529_v10 = vld [vmem:[#allocation2 + $0x18] sm:$0xff] }
 0x13e   : > { %v540_v15 = vadd.f32 %v693_v58, %v529_v10  ;;  %v543_v17 = vmax.f32 %v539_v14, 0.0 }
 0x140   : > { %v544_v18 = vmax.f32 %v540_v15, 0.0 }
 0x142   : > { %v546_v19 = vpack.c.bf16 %v544_v18, %v543_v17 }
 0x144   : > { %781 = vmatmul.mubr.bf16.vlgmr.msra.gmra.mrb[0].mxu0 %v546_v19 }
 0x217   : > { %v782_v21 = vpop.f32.mrb[0].mxu0 }
 0x218   : > { %v621_v22 = vadd.f32 %v782_v21, %v694_v20  ;;  %v612_v23 = vpop.f32.mrb[1].mxu0 }
 0x219   : > { %v613_v24 = vadd.f32 %v694_v20, %v612_v23  ;;  %v783_v25 = vpop.f32.mrb[2].mxu0 }
 0x21a   : > { %v629_v26 = vmax.f32 %v621_v22, 0.0  ;;  %v624_v27 = vadd.f32 %v783_v25, %v694_v20  ;;  %v615_v28 = vpop.f32.mrb[3].mxu0 }
 0x21b   : > { %v627_v29 = vmax.f32 %v613_v24, 0.0  ;;  %v616_v30 = vadd.f32 %v694_v20, %v615_v28 }
 0x21c   : > { %633 = vst [vmem:[%s1092_s5 + $0x10] sm:$0xff] %v629_v26  ;;  %v630_v31 = vmax.f32 %v624_v27, 0.0 }
 0x21d   : > { %631 = vst [vmem:[%s1092_s5] sm:$0xff] %v627_v29  ;;  %v628_v32 = vmax.f32 %v616_v30, 0.0 }
 0x21e   : > { %634 = vst [vmem:[%s1092_s5 + $0x18] sm:$0xff] %v630_v31 }
 0x21f   : > { %632 = vst [vmem:[%s1092_s5 + $0x8] sm:$0xff] %v628_v32 }
 0x220 PF: > { %p12_p11 = scmp.ge.s32.totalorder %s883_s22, 5   ;;  %s1093_s18 = smov %s827_s19 }
 0x221   : > { %s1094_s19 = smov %s892_s25  ;;  %s1095_s20 = smov %s883_s22 }
 0x222   :  { %14 = sbr.rel (!%p12_p11) target bundleno = 2 (0x2), region = 105 }

// kernel: two_stage_detector_forward.5
= control target key start
LH: loop header
LB: loop body
LE: loop exit
PB: predicated region body
PF: predicated region fallthrough
CT: control target
= control target key end

     0   :  { %s2327_s17 = smov 0   ;;  %s3411_s0 = inlined_call_operand.vmem [shape: f32[2,1,2048], index: 0, kind: input, shape index: {}, may-alias: {0,1}]   ;;  %s3412_s1 = inlined_call_operand.vmem [shape: f32[2,16,128], index: 1, kind: input, shape index: {}, may-alias: {0,1}]   ;;  %s3413_s2 = inlined_call_operand.vmem [shape: f32[2048,128], index: 2, kind: input, shape index: {}]   ;;  %s3414_s3 = inlined_call_operand.vmem [shape: f32[1,128], index: 3, kind: input, shape index: {}]   ;;  %s3415_s4 = inlined_call_operand.vmem [shape: f32[128,128], index: 4, kind: input, shape index: {}]   ;;  %s3416_s5 = inlined_call_operand.vmem [shape: f32[1,128], index: 5, kind: input, shape index: {}]   ;;  %s3417_s6 = inlined_call_operand.vmem [shape: f32[128,128], index: 6, kind: input, shape index: {}]   ;;  %s3418_s7 = inlined_call_operand.vmem [shape: f32[1,128], index: 7, kind: input, shape index: {}]   ;;  %s3419_s8 = inlined_call_operand.vmem [shape: f32[128,128], index: 8, kind: input, shape index: {}]   ;;  %s3420_s9 = inlined_call_operand.vmem [shape: f32[1,128], index: 9, kind: input, shape index: {}]   ;;  %s3421_s10 = inlined_call_operand.vmem [shape: f32[2,1,128], index: 10, kind: output, shape index: {0}]   ;;  %s3422_s11 = inlined_call_operand.vmem [shape: f32[2,8,128], index: 11, kind: output, shape index: {1}]  }
   0x1 LB: > { %s1781_s18 = sadd.s32 4294967295, %s2255_s17   ;;  %p1785_p0 = scmp.ge.s32.totalorder %s2255_s17, 1  ;;  %s2255_s17 = sphi %s2327_s17, %s22_s17  }
   0x2   : > { %p349_p1 = scmp.lt.s32.totalorder %s2255_s17, 3 }
   0x4   : > { %p350_p2 = pnand %p1785_p0, %p349_p1 }
   0x5   : > { %v528_v0 = vld [vmem:[%s3413_s2 + $0x80] sm:$0xff] (!%p350_p2)  ;;  %v529_v1 = vld [vmem:[%s3413_s2 + $0x88] sm:$0xff] (!%p350_p2)  ;;  %v530_v11 = vld [vmem:[%s3413_s2 + $0x90] sm:$0xff] (!%p350_p2)  ;;  %p2409_p3 = scmp.lt.s32.totalorder (!%p350_p2), %s1781_s18, 1  ;;  %v416_v47 = vlaneseq (!%p350_p2)  ;;  %vm1219_vm0 = vcmask (!%p350_p2), 24576   ;;  %s2259_s16 = smov (!%p350_p2), 116  }
   0x6   : > { %353 = sbr.rel (%p350_p2) target bundleno = 1878 (0x756), region = 60  ;;  %v560_v2 = vld [vmem:[%s3413_s2 + $0x180] sm:$0xff] (!%p350_p2)  ;;  %v776_v3 = vpack.c.bf16 (!%p350_p2), %v529_v1, %v528_v0  ;;  %v561_v4 = vld [vmem:[%s3413_s2 + $0x188] sm:$0xff] (!%p350_p2)  ;;  %v531_v13 = vld [vmem:[%s3413_s2 + $0x98] sm:$0xff] (!%p350_p2)  ;;  %s2260_s19 = smov (!%p350_p2), 124   ;;  %vm2261_vm1 = vmmov (!%p350_p2), 0  }
   0x7   : > { %v512_v5 = vld [vmem:[%s3413_s2] sm:$0xff] (!%p350_p2)  ;;  %v513_v6 = vld [vmem:[%s3413_s2 + $0x8] sm:$0xff] (!%p350_p2)  ;;  %v792_v7 = vpack.c.bf16 (!%p350_p2), %v561_v4, %v560_v2  ;;  %v562_v14 = vld [vmem:[%s3413_s2 + $0x190] sm:$0xff] (!%p350_p2)  ;;  %v777_v16 = vpack.c.bf16 (!%p350_p2), %v531_v13, %v530_v11  ;;  %v2473_v61 = vshrl.u32 (!%p350_p2), %v416_v47, 7  ;;  %s2262_s20 = smov (!%p350_p2), 112   ;;  %s2265_s27 = smov (!%p350_p2), 108  }
   0x8   : > { %v768_v8 = vpack.c.bf16 (!%p350_p2), %v513_v6, %v512_v5  ;;  %v544_v9 = vld [vmem:[%s3413_s2 + $0x100] sm:$0xff] (!%p350_p2)  ;;  %v545_v10 = vld [vmem:[%s3413_s2 + $0x108] sm:$0xff] (!%p350_p2)  ;;  %1797 = vmatprep.subr.bf16.mxu0 (!%p350_p2), %v776_v3  ;;  %v563_v15 = vld [vmem:[%s3413_s2 + $0x198] sm:$0xff] (!%p350_p2)  ;;  %s2266_s28 = smov (!%p350_p2), 100   ;;  %vm1417_vm2 = vcmask (!%p350_p2), 130048  }
   0x9   : > { %v784_v12 = vpack.c.bf16 (!%p350_p2), %v545_v10, %v544_v9  ;;  %1819 = vmatprep.subr.bf16.mxu1 (!%p350_p2), %v792_v7  ;;  %v793_v17 = vpack.c.bf16 (!%p350_p2), %v563_v15, %v562_v14  ;;  %v514_v18 = vld [vmem:[%s3413_s2 + $0x10] sm:$0xff] (!%p350_p2)  ;;  %v515_v19 = vld [vmem:[%s3413_s2 + $0x18] sm:$0xff] (!%p350_p2)  ;;  %v532_v23 = vld [vmem:[%s3413_s2 + $0xa0] sm:$0xff] (!%p350_p2)  ;;  %v422_v10 = vsub.s32 (!%p350_p2), 1, %v2473_v61  ;;  %v430_v11 = vsub.s32 (!%p350_p2), 3, %v2473_v61 }
   0xa   : > { %1798 = vmatpush3.bf16.msra.mxu0 (!%p350_p2), %v768_v8  ;;  %v546_v20 = vld [vmem:[%s3413_s2 + $0x110] sm:$0xff] (!%p350_p2)  ;;  %v769_v21 = vpack.c.bf16 (!%p350_p2), %v515_v19, %v514_v18  ;;  %v547_v22 = vld [vmem:[%s3413_s2 + $0x118] sm:$0xff] (!%p350_p2)  ;;  %v533_v24 = vld [vmem:[%s3413_s2 + $0xa8] sm:$0xff] (!%p350_p2)  ;;  %v446_v47 = vsub.s32 (!%p350_p2), 7, %v2473_v61 }
   0xb   : > { %1820 = vmatpush3.bf16.msra.mxu1 (!%p350_p2), %v784_v12  ;;  %1799 = vmatprep.subr.bf16.mxu0 (!%p350_p2), %v777_v16  ;;  %v785_v25 = vpack.c.bf16 (!%p350_p2), %v547_v22, %v546_v20  ;;  %v778_v26 = vpack.c.bf16 (!%p350_p2), %v533_v24, %v532_v23  ;;  %v564_v27 = vld [vmem:[%s3413_s2 + $0x1a0] sm:$0xff] (!%p350_p2)  ;;  %v565_v28 = vld [vmem:[%s3413_s2 + $0x1a8] sm:$0xff] (!%p350_p2)  ;;  %v534_v35 = vld [vmem:[%s3413_s2 + $0xb0] sm:$0xff] (!%p350_p2) }
   0xc   : > { %1821 = vmatprep.subr.bf16.mxu1 (!%p350_p2), %v793_v17  ;;  %v516_v29 = vld [vmem:[%s3413_s2 + $0x20] sm:$0xff] (!%p350_p2)  ;;  %v794_v30 = vpack.c.bf16 (!%p350_p2), %v565_v28, %v564_v27  ;;  %v517_v31 = vld [vmem:[%s3413_s2 + $0x28] sm:$0xff] (!%p350_p2)  ;;  %v535_v36 = vld [vmem:[%s3413_s2 + $0xb8] sm:$0xff] (!%p350_p2) }
   0xd   : > { %v548_v32 = vld [vmem:[%s3413_s2 + $0x120] sm:$0xff]  ;;  %v549_v33 = vld [vmem:[%s3413_s2 + $0x128] sm:$0xff]  ;;  %v770_v34 = vpack.c.bf16 %v517_v31, %v516_v29  ;;  %v566_v37 = vld [vmem:[%s3413_s2 + $0x1b0] sm:$0xff]  ;;  %v779_v39 = vpack.c.bf16 %v535_v36, %v534_v35  ;;  %s3425_s18 = smov (!%p2409_p3, %s1781_s18), 1  ;;  %v418_v29 = vsub.s32 0, %v2473_v61 }
   0xe   : > { %1800 = vmatpush3.bf16.msra.mxu0 %v769_v21  ;;  %v786_v38 = vpack.c.bf16 %v549_v33, %v548_v32  ;;  %v567_v40 = vld [vmem:[%s3413_s2 + $0x1b8] sm:$0xff]  ;;  %v518_v41 = vld [vmem:[%s3413_s2 + $0x30] sm:$0xff]  ;;  %v536_v46 = vld [vmem:[%s3413_s2 + $0xc0] sm:$0xff]  ;;  %s1786_s24 = sshll.u32 %s3425_s18, 4  ;;  %v426_v33 = vsub.s32 2, %v2473_v61  ;;  %s406_s26 = scalar_lea.vmem %s3421_s10, %s3425_s18 }
   0xf   : > { %1822 = vmatpush3.bf16.msra.mxu1 %v785_v25  ;;  %1801 = vmatprep.subr.bf16.mxu0 %v778_v26  ;;  %v519_v42 = vld [vmem:[%s3413_s2 + $0x38] sm:$0xff]  ;;  %v795_v43 = vpack.c.bf16 %v567_v40, %v566_v37  ;;  %v550_v44 = vld [vmem:[%s3413_s2 + $0x130] sm:$0xff]  ;;  %v537_v48 = vld [vmem:[%s3413_s2 + $0xc8] sm:$0xff]  ;;  %s2505_s22 = scalar_lea.vmem %s3411_s0, %s1786_s24  ;;  %s403_s25 = scalar_lea.vmem %s3412_s1, %s1786_s24 }
  0x10   : > { %1823 = vmatprep.subr.bf16.mxu1 %v794_v30  ;;  %v551_v45 = vld [vmem:[%s3413_s2 + $0x138] sm:$0xff]  ;;  %v568_v49 = vld [vmem:[%s3413_s2 + $0x1c0] sm:$0xff]  ;;  %v569_v50 = vld [vmem:[%s3413_s2 + $0x1c8] sm:$0xff]  ;;  %v771_v51 = vpack.c.bf16 %v519_v42, %v518_v41  ;;  %v780_v53 = vpack.c.bf16 %v537_v48, %v536_v46  ;;  %s1789_s30 = sshll.u32 %s3425_s18, 3 }
  0x11   : > { %v787_v52 = vpack.c.bf16 %v551_v45, %v550_v44  ;;  %v520_v54 = vld [vmem:[%s3413_s2 + $0x40] sm:$0xff]  ;;  %v521_v55 = vld [vmem:[%s3413_s2 + $0x48] sm:$0xff]  ;;  %v796_v57 = vpack.c.bf16 %v569_v50, %v568_v49  ;;  %v538_v59 = vld [vmem:[%s3413_s2 + $0xd0] sm:$0xff]  ;;  %s410_s13 = scalar_lea.vmem %s3422_s11, %s1789_s30 }
  0x12   : > { %1802 = vmatpush3.bf16.msra.mxu0 %v770_v34  ;;  %v552_v56 = vld [vmem:[%s3413_s2 + $0x140] sm:$0xff]  ;;  %v553_v58 = vld [vmem:[%s3413_s2 + $0x148] sm:$0xff]  ;;  %v539_v60 = vld [vmem:[%s3413_s2 + $0xd8] sm:$0xff]  ;;  %v772_v0 = vpack.c.bf16 %v521_v55, %v520_v54 }
  0x13   : > { %1824 = vmatpush3.bf16.msra.mxu1 %v786_v38  ;;  %1803 = vmatprep.subr.bf16.mxu0 %v779_v39  ;;  %v570_v62 = vld [vmem:[%s3413_s2 + $0x1d0] sm:$0xff]  ;;  %v571_v63 = vld [vmem:[%s3413_s2 + $0x1d8] sm:$0xff]  ;;  %v788_v1 = vpack.c.bf16 %v553_v58, %v552_v56  ;;  %v781_v2 = vpack.c.bf16 %v539_v60, %v538_v59  ;;  %v540_v8 = vld [vmem:[%s3413_s2 + $0xe0] sm:$0xff] }
  0x14   : > { %1825 = vmatprep.subr.bf16.mxu1 %v795_v43  ;;  %v522_v3 = vld [vmem:[%s3413_s2 + $0x50] sm:$0xff]  ;;  %v523_v4 = vld [vmem:[%s3413_s2 + $0x58] sm:$0xff]  ;;  %v797_v6 = vpack.c.bf16 %v571_v63, %v570_v62  ;;  %v541_v9 = vld [vmem:[%s3413_s2 + $0xe8] sm:$0xff]  ;;  %v438_v43 = vsub.s32 5, %v2473_v61 }
  0x15   : > { %v554_v5 = vld [vmem:[%s3413_s2 + $0x150] sm:$0xff]  ;;  %v555_v7 = vld [vmem:[%s3413_s2 + $0x158] sm:$0xff]  ;;  %v572_v12 = vld [vmem:[%s3413_s2 + $0x1e0] sm:$0xff]  ;;  %v773_v14 = vpack.c.bf16 %v523_v4, %v522_v3  ;;  %v782_v17 = vpack.c.bf16 %v541_v9, %v540_v8 }
  0x16   : > { %1804 = vmatpush3.bf16.msra.mxu0 %v771_v51  ;;  %v573_v13 = vld [vmem:[%s3413_s2 + $0x1e8] sm:$0xff]  ;;  %v524_v15 = vld [vmem:[%s3413_s2 + $0x60] sm:$0xff]  ;;  %v789_v16 = vpack.c.bf16 %v555_v7, %v554_v5  ;;  %v542_v23 = vld [vmem:[%s3413_s2 + $0xf0] sm:$0xff] }
  0x17   : > { %1826 = vmatpush3.bf16.msra.mxu1 %v787_v52  ;;  %1805 = vmatprep.subr.bf16.mxu0 %v780_v53  ;;  %v525_v18 = vld [vmem:[%s3413_s2 + $0x68] sm:$0xff]  ;;  %v556_v19 = vld [vmem:[%s3413_s2 + $0x160] sm:$0xff]  ;;  %v798_v21 = vpack.c.bf16 %v573_v13, %v572_v12  ;;  %v543_v24 = vld [vmem:[%s3413_s2 + $0xf8] sm:$0xff] }
  0x18   : > { %1827 = vmatprep.subr.bf16.mxu1 %v796_v57  ;;  %v2525_v20 = vld [vmem:[%s2505_s22] sm:$0xff]  ;;  %v557_v22 = vld [vmem:[%s3413_s2 + $0x168] sm:$0xff]  ;;  %v574_v27 = vld [vmem:[%s3413_s2 + $0x1f0] sm:$0xff]  ;;  %v774_v30 = vpack.c.bf16 %v525_v18, %v524_v15  ;;  %v783_v35 = vpack.c.bf16 %v543_v24, %v542_v23 }
  0x19   : > { %v423_v25 = vrot.slane %v2525_v20, %v422_v10  ;;  %v431_v26 = vrot.slane %v2525_v20, %v430_v11  ;;  %v575_v28 = vld [vmem:[%s3413_s2 + $0x1f8] sm:$0xff]  ;;  %v790_v34 = vpack.c.bf16 %v557_v22, %v556_v19  ;;  %v526_v36 = vld [vmem:[%s3413_s2 + $0x70] sm:$0xff]  ;;  %v592_v41 = vld [vmem:[%s3413_s2 + $0x280] sm:$0xff]  ;;  %v419_v44 = vrot.slane %v2525_v20, %v418_v29 }
  0x1a   : > { %1806 = vmatpush3.bf16.msra.mxu0 %v772_v0  ;;  %v527_v37 = vld [vmem:[%s3413_s2 + $0x78] sm:$0xff]  ;;  %v558_v38 = vld [vmem:[%s3413_s2 + $0x170] sm:$0xff]  ;;  %v799_v39 = vpack.c.bf16 %v575_v28, %v574_v27  ;;  %v593_v42 = vld [vmem:[%s3413_s2 + $0x288] sm:$0xff]  ;;  %v427_v49 = vrot.slane %v2525_v20, %v426_v33  ;;  %v439_v59 = vrot.slane %v2525_v20, %v438_v43  ;;  %v447_v0 = vrot.slane %v2525_v20, %v446_v47 }
  0x1b   : > { %1828 = vmatpush3.bf16.msra.mxu1 %v788_v1  ;;  %1807 = vmatprep.subr.bf16.mxu0 %v781_v2  ;;  %v497_v31 = vpack.c.bf16 %v423_v25, %v423_v25  ;;  %v499_v32 = vpack.c.bf16 %v431_v26, %v431_v26  ;;  %v559_v40 = vld [vmem:[%s3413_s2 + $0x178] sm:$0xff]  ;;  %v624_v45 = vld [vmem:[%s3413_s2 + $0x380] sm:$0xff]  ;;  %v625_v46 = vld [vmem:[%s3413_s2 + $0x388] sm:$0xff]  ;;  %v775_v48 = vpack.c.bf16 %v527_v37, %v526_v36 }
  0x1c   : > { %1829 = vmatprep.subr.bf16.mxu1 %v797_v6  ;;  %v791_v50 = vpack.c.bf16 %v559_v40, %v558_v38  ;;  %v808_v51 = vpack.c.bf16 %v593_v42, %v592_v41  ;;  %v576_v52 = vld [vmem:[%s3413_s2 + $0x200] sm:$0xff]  ;;  %v577_v53 = vld [vmem:[%s3413_s2 + $0x208] sm:$0xff]  ;;  %v824_v55 = vpack.c.bf16 %v625_v46, %v624_v45  ;;  %v594_v57 = vld [vmem:[%s3413_s2 + $0x290] sm:$0xff]  ;;  %v496_v60 = vpack.c.bf16 %v419_v44, %v419_v44 }
  0x1d   : > { %929 = vmatprep.mubr.bf16.mxu0 %v497_v31  ;;  %969 = vmatprep.mubr.bf16.mxu1 %v499_v32  ;;  %v608_v54 = vld [vmem:[%s3413_s2 + $0x300] sm:$0xff]  ;;  %v609_v56 = vld [vmem:[%s3413_s2 + $0x308] sm:$0xff]  ;;  %v595_v58 = vld [vmem:[%s3413_s2 + $0x298] sm:$0xff]  ;;  %v498_v1 = vpack.c.bf16 %v427_v49, %v427_v49  ;;  %v800_v2 = vpack.c.bf16 %v577_v53, %v576_v52 }
  0x1e   : > { %1808 = vmatpush3.bf16.msra.mxu0 %v773_v14  ;;  %v626_v62 = vld [vmem:[%s3413_s2 + $0x390] sm:$0xff]  ;;  %v627_v63 = vld [vmem:[%s3413_s2 + $0x398] sm:$0xff]  ;;  %v816_v3 = vpack.c.bf16 %v609_v56, %v608_v54  ;;  %v809_v4 = vpack.c.bf16 %v595_v58, %v594_v57  ;;  %v596_v12 = vld [vmem:[%s3413_s2 + $0x2a0] sm:$0xff]  ;;  %v501_v14 = vpack.c.bf16 %v439_v59, %v439_v59 }
  0x1f   : > { %1830 = vmatpush3.bf16.msra.mxu1 %v789_v16  ;;  %1809 = vmatprep.subr.bf16.mxu0 %v782_v17  ;;  %v578_v5 = vld [vmem:[%s3413_s2 + $0x210] sm:$0xff]  ;;  %v579_v6 = vld [vmem:[%s3413_s2 + $0x218] sm:$0xff]  ;;  %v825_v8 = vpack.c.bf16 %v627_v63, %v626_v62  ;;  %v597_v13 = vld [vmem:[%s3413_s2 + $0x2a8] sm:$0xff]  ;;  %v503_v17 = vpack.c.bf16 %v447_v0, %v447_v0 }
  0x20   : > { %1831 = vmatprep.subr.bf16.mxu1 %v798_v21  ;;  %v610_v7 = vld [vmem:[%s3413_s2 + $0x310] sm:$0xff]  ;;  %v611_v9 = vld [vmem:[%s3413_s2 + $0x318] sm:$0xff]  ;;  %v628_v15 = vld [vmem:[%s3413_s2 + $0x3a0] sm:$0xff]  ;;  %v801_v18 = vpack.c.bf16 %v579_v6, %v578_v5  ;;  %v810_v21 = vpack.c.bf16 %v597_v13, %v596_v12 }
  0x21   : > { %v629_v16 = vld [vmem:[%s3413_s2 + $0x3a8] sm:$0xff]  ;;  %v817_v19 = vpack.c.bf16 %v611_v9, %v610_v7  ;;  %v580_v22 = vld [vmem:[%s3413_s2 + $0x220] sm:$0xff]  ;;  %v598_v27 = vld [vmem:[%s3413_s2 + $0x2b0] sm:$0xff] }
  0x22   : > { %1810 = vmatpush3.bf16.msra.mxu0 %v774_v30  ;;  %v581_v23 = vld [vmem:[%s3413_s2 + $0x228] sm:$0xff]  ;;  %v612_v24 = vld [vmem:[%s3413_s2 + $0x320] sm:$0xff]  ;;  %v826_v25 = vpack.c.bf16 %v629_v16, %v628_v15  ;;  %v599_v28 = vld [vmem:[%s3413_s2 + $0x2b8] sm:$0xff] }
  0x23   : > { %1832 = vmatpush3.bf16.msra.mxu1 %v790_v34  ;;  %1811 = vmatprep.subr.bf16.mxu0 %v783_v35  ;;  %v613_v26 = vld [vmem:[%s3413_s2 + $0x328] sm:$0xff]  ;;  %v630_v30 = vld [vmem:[%s3413_s2 + $0x3b0] sm:$0xff]  ;;  %v631_v31 = vld [vmem:[%s3413_s2 + $0x3b8] sm:$0xff]  ;;  %v802_v32 = vpack.c.bf16 %v581_v23, %v580_v22  ;;  %v811_v35 = vpack.c.bf16 %v599_v28, %v598_v27  ;;  %v434_v23 = vsub.s32 4, %v2473_v61 }
  0x24   : > { %1833 = vmatprep.subr.bf16.mxu1 %v799_v39  ;;  %v818_v34 = vpack.c.bf16 %v613_v26, %v612_v24  ;;  %v582_v36 = vld [vmem:[%s3413_s2 + $0x230] sm:$0xff]  ;;  %v583_v37 = vld [vmem:[%s3413_s2 + $0x238] sm:$0xff]  ;;  %v827_v39 = vpack.c.bf16 %v631_v31, %v630_v30  ;;  %v600_v41 = vld [vmem:[%s3413_s2 + $0x2c0] sm:$0xff] }
  0x25   : > { %v614_v38 = vld [vmem:[%s3413_s2 + $0x330] sm:$0xff]  ;;  %v615_v40 = vld [vmem:[%s3413_s2 + $0x338] sm:$0xff]  ;;  %v601_v42 = vld [vmem:[%s3413_s2 + $0x2c8] sm:$0xff]  ;;  %v803_v46 = vpack.c.bf16 %v583_v37, %v582_v36 }
  0x26   : > { %1812 = vmatpush3.bf16.msra.mxu0 %v775_v48  ;;  %v632_v44 = vld [vmem:[%s3413_s2 + $0x3c0] sm:$0xff]  ;;  %v633_v45 = vld [vmem:[%s3413_s2 + $0x3c8] sm:$0xff]  ;;  %v819_v48 = vpack.c.bf16 %v615_v40, %v614_v38  ;;  %v812_v49 = vpack.c.bf16 %v601_v42, %v600_v41  ;;  %v603_v56 = vld [vmem:[%s3413_s2 + $0x2d8] sm:$0xff]  ;;  %v435_v38 = vrot.slane %v2525_v20, %v434_v23 }
  0x27   : > { %1834 = vmatpush3.bf16.msra.mxu1 %v791_v50  ;;  %1841 = vmatprep.subr.bf16.mxu0 %v808_v51  ;;  %v584_v50 = vld [vmem:[%s3413_s2 + $0x240] sm:$0xff]  ;;  %v585_v51 = vld [vmem:[%s3413_s2 + $0x248] sm:$0xff]  ;;  %v828_v53 = vpack.c.bf16 %v633_v45, %v632_v44  ;;  %v634_v57 = vld [vmem:[%s3413_s2 + $0x3d0] sm:$0xff] }
  0x28   : > { %1863 = vmatprep.subr.bf16.mxu1 %v824_v55  ;;  %v616_v52 = vld [vmem:[%s3413_s2 + $0x340] sm:$0xff]  ;;  %v617_v54 = vld [vmem:[%s3413_s2 + $0x348] sm:$0xff]  ;;  %v602_v55 = vld [vmem:[%s3413_s2 + $0x2d0] sm:$0xff]  ;;  %v804_v59 = vpack.c.bf16 %v585_v51, %v584_v50 }
  0x29   : > { %930 = vmatmul.mubr.bf16.vlgmr.msra.gmra.mrb[0].mxu0 %v496_v60  ;;  %v635_v58 = vld [vmem:[%s3413_s2 + $0x3d8] sm:$0xff]  ;;  %v820_v60 = vpack.c.bf16 %v617_v54, %v616_v52  ;;  %v813_v62 = vpack.c.bf16 %v603_v56, %v602_v55  ;;  %v586_v63 = vld [vmem:[%s3413_s2 + $0x250] sm:$0xff]  ;;  %v605_v5 = vld [vmem:[%s3413_s2 + $0x2e8] sm:$0xff]  ;;  %v500_v54 = vpack.c.bf16 %v435_v38, %v435_v38 }
  0x2a   : > { %970 = vmatmul.mubr.bf16.vlgmr.msra.gmra.mrb[0].mxu1 %v498_v1  ;;  %1842 = vmatpush3.bf16.msra.mxu0 %v800_v2  ;;  %v587_v0 = vld [vmem:[%s3413_s2 + $0x258] sm:$0xff]  ;;  %v618_v1 = vld [vmem:[%s3413_s2 + $0x350] sm:$0xff]  ;;  %v829_v2 = vpack.c.bf16 %v635_v58, %v634_v57  ;;  %v636_v6 = vld [vmem:[%s3413_s2 + $0x3e0] sm:$0xff] }
  0x2b   : > { %1864 = vmatpush3.bf16.msra.mxu1 %v816_v3  ;;  %1843 = vmatprep.subr.bf16.mxu0 %v809_v4  ;;  %v619_v3 = vld [vmem:[%s3413_s2 + $0x358] sm:$0xff]  ;;  %v604_v4 = vld [vmem:[%s3413_s2 + $0x2e0] sm:$0xff]  ;;  %v637_v7 = vld [vmem:[%s3413_s2 + $0x3e8] sm:$0xff] }
  0x2c   : > { %1865 = vmatprep.subr.bf16.mxu1 %v825_v8  ;;  %1009 = vmatprep.mubr.bf16.mxu0 %v501_v14  ;;  %v805_v8 = vpack.c.bf16 %v587_v0, %v586_v63  ;;  %v821_v9 = vpack.c.bf16 %v619_v3, %v618_v1  ;;  %v814_v12 = vpack.c.bf16 %v605_v5, %v604_v4  ;;  %v588_v13 = vld [vmem:[%s3413_s2 + $0x260] sm:$0xff]  ;;  %v589_v14 = vld [vmem:[%s3413_s2 + $0x268] sm:$0xff]  ;;  %v639_v22 = vld [vmem:[%s3413_s2 + $0x3f8] sm:$0xff] }
  0x2d   : > { %1049 = vmatprep.mubr.bf16.mxu1 %v503_v17  ;;  %v620_v15 = vld [vmem:[%s3413_s2 + $0x360] sm:$0xff]  ;;  %v830_v16 = vpack.c.bf16 %v637_v7, %v636_v6  ;;  %v621_v17 = vld [vmem:[%s3413_s2 + $0x368] sm:$0xff]  ;;  %v806_v24 = vpack.c.bf16 %v589_v14, %v588_v13  ;;  %v590_v28 = vld [vmem:[%s3413_s2 + $0x270] sm:$0xff] }
  0x2e   : > { %1844 = vmatpush3.bf16.msra.mxu0 %v801_v18  ;;  %v606_v18 = vld [vmem:[%s3413_s2 + $0x2f0] sm:$0xff]  ;;  %v822_v26 = vpack.c.bf16 %v621_v17, %v620_v15  ;;  %v591_v30 = vld [vmem:[%s3413_s2 + $0x278] sm:$0xff]  ;;  %v657_v36 = vld [vmem:[%s3413_s2 + $0x488] sm:$0xff] }
  0x2f   : > { %1866 = vmatpush3.bf16.msra.mxu1 %v817_v19  ;;  %1845 = vmatprep.subr.bf16.mxu0 %v810_v21  ;;  %v607_v19 = vld [vmem:[%s3413_s2 + $0x2f8] sm:$0xff]  ;;  %v638_v21 = vld [vmem:[%s3413_s2 + $0x3f0] sm:$0xff]  ;;  %v2777_v37 = vld [vmem:[%s2505_s22 + $0x8] sm:$0xff]  ;;  %v807_v41 = vpack.c.bf16 %v591_v30, %v590_v28  ;;  %s2263_s22 = smov 120  }
  0x30   : > { %1867 = vmatprep.subr.bf16.mxu1 %v826_v25  ;;  %v442_v25 = vsub.s32 6, %v2473_v61  ;;  %v815_v27 = vpack.c.bf16 %v607_v19, %v606_v18  ;;  %v622_v31 = vld [vmem:[%s3413_s2 + $0x370] sm:$0xff]  ;;  %v689_v40 = vld [vmem:[%s3413_s2 + $0x588] sm:$0xff]  ;;  %v659_v52 = vld [vmem:[%s3413_s2 + $0x498] sm:$0xff]  ;;  %v463_v57 = vrot.slane %v2777_v37, %v430_v11 }
  0x31   : > { %v658_v51 = vld [vmem:[%s3413_s2 + $0x490] sm:$0xff]  ;;  %v691_v56 = vld [vmem:[%s3413_s2 + $0x598] sm:$0xff]  ;;  %v661_v3 = vld [vmem:[%s3413_s2 + $0x4a8] sm:$0xff] }
  0x32   : > { %1846 = vmatpush3.bf16.msra.mxu0 %v802_v32  ;;  %v831_v32 = vpack.c.bf16 %v639_v22, %v638_v21  ;;  %v443_v42 = vrot.slane %v2525_v20, %v442_v25  ;;  %v673_v20 = vld [vmem:[%s3413_s2 + $0x508] sm:$0xff]  ;;  %v690_v55 = vld [vmem:[%s3413_s2 + $0x590] sm:$0xff]  ;;  %v643_v63 = vld [vmem:[%s3413_s2 + $0x418] sm:$0xff]  ;;  %v507_v7 = vpack.c.bf16 %v463_v57, %v463_v57 }
  0x33   : > { %1868 = vmatpush3.bf16.msra.mxu1 %v818_v34  ;;  %1847 = vmatprep.subr.bf16.mxu0 %v811_v35  ;;  %v623_v34 = vld [vmem:[%s3413_s2 + $0x378] sm:$0xff]  ;;  %v656_v35 = vld [vmem:[%s3413_s2 + $0x480] sm:$0xff]  ;;  %v674_v0 = vld [vmem:[%s3413_s2 + $0x510] sm:$0xff]  ;;  %v857_v11 = vpack.c.bf16 %v691_v56, %v690_v55 }
  0x34   : > { %1869 = vmatprep.subr.bf16.mxu1 %v827_v39  ;;  %v688_v39 = vld [vmem:[%s3413_s2 + $0x580] sm:$0xff]  ;;  %v823_v44 = vpack.c.bf16 %v623_v34, %v622_v31  ;;  %v840_v45 = vpack.c.bf16 %v657_v36, %v656_v35  ;;  %v502_v58 = vpack.c.bf16 %v443_v42, %v443_v42  ;;  %v675_v1 = vld [vmem:[%s3413_s2 + $0x518] sm:$0xff]  ;;  %v693_v6 = vld [vmem:[%s3413_s2 + $0x5a8] sm:$0xff] }
  0x35   : > { %v856_v50 = vpack.c.bf16 %v689_v40, %v688_v39  ;;  %v692_v5 = vld [vmem:[%s3413_s2 + $0x5a0] sm:$0xff]  ;;  %v645_v14 = vld [vmem:[%s3413_s2 + $0x428] sm:$0xff]  ;;  %v662_v18 = vld [vmem:[%s3413_s2 + $0x4b0] sm:$0xff] }
  0x36   : > { %1848 = vmatpush3.bf16.msra.mxu0 %v803_v46  ;;  %v640_v46 = vld [vmem:[%s3413_s2 + $0x400] sm:$0xff]  ;;  %v677_v17 = vld [vmem:[%s3413_s2 + $0x528] sm:$0xff]  ;;  %v663_v19 = vld [vmem:[%s3413_s2 + $0x4b8] sm:$0xff] }
  0x37   : > { %1870 = vmatpush3.bf16.msra.mxu1 %v819_v48  ;;  %1849 = vmatprep.subr.bf16.mxu0 %v812_v49  ;;  %v641_v48 = vld [vmem:[%s3413_s2 + $0x408] sm:$0xff]  ;;  %v672_v49 = vld [vmem:[%s3413_s2 + $0x500] sm:$0xff]  ;;  %v694_v21 = vld [vmem:[%s3413_s2 + $0x5b0] sm:$0xff] }
  0x38   : > { %1871 = vmatprep.subr.bf16.mxu1 %v828_v53  ;;  %v455_v53 = vrot.slane %v2777_v37, %v422_v10  ;;  %v841_v10 = vpack.c.bf16 %v659_v52, %v658_v51  ;;  %v644_v13 = vld [vmem:[%s3413_s2 + $0x420] sm:$0xff]  ;;  %v695_v22 = vld [vmem:[%s3413_s2 + $0x5b8] sm:$0xff]  ;;  %v646_v28 = vld [vmem:[%s3413_s2 + $0x430] sm:$0xff] }
  0x39   : > { %v676_v15 = vld [vmem:[%s3413_s2 + $0x520] sm:$0xff]  ;;  %v647_v30 = vld [vmem:[%s3413_s2 + $0x438] sm:$0xff]  ;;  %v678_v31 = vld [vmem:[%s3413_s2 + $0x530] sm:$0xff] }
  0x3a   : > { %1850 = vmatpush3.bf16.msra.mxu0 %v804_v59  ;;  %v832_v59 = vpack.c.bf16 %v641_v48, %v640_v46  ;;  %v505_v4 = vpack.c.bf16 %v455_v53, %v455_v53  ;;  %v679_v34 = vld [vmem:[%s3413_s2 + $0x538] sm:$0xff]  ;;  %v664_v35 = vld [vmem:[%s3413_s2 + $0x4c0] sm:$0xff]  ;;  %v665_v36 = vld [vmem:[%s3413_s2 + $0x4c8] sm:$0xff]  ;;  %v835_v40 = vpack.c.bf16 %v647_v30, %v646_v28 }
  0x3b   : > { %1872 = vmatpush3.bf16.msra.mxu1 %v820_v60  ;;  %1851 = vmatprep.subr.bf16.mxu0 %v813_v62  ;;  %v848_v60 = vpack.c.bf16 %v673_v20, %v672_v49  ;;  %v642_v62 = vld [vmem:[%s3413_s2 + $0x410] sm:$0xff]  ;;  %v696_v38 = vld [vmem:[%s3413_s2 + $0x5c0] sm:$0xff]  ;;  %v697_v39 = vld [vmem:[%s3413_s2 + $0x5c8] sm:$0xff]  ;;  %v844_v42 = vpack.c.bf16 %v665_v36, %v664_v35 }
  0x3c   : > { %1873 = vmatprep.subr.bf16.mxu1 %v829_v2  ;;  %v660_v2 = vld [vmem:[%s3413_s2 + $0x4a0] sm:$0xff]  ;;  %v860_v48 = vpack.c.bf16 %v697_v39, %v696_v38  ;;  %v681_v49 = vld [vmem:[%s3413_s2 + $0x548] sm:$0xff]  ;;  %v667_v20 = vld [vmem:[%s3413_s2 + $0x4d8] sm:$0xff] }
  0x3d   : > { %v680_v46 = vld [vmem:[%s3413_s2 + $0x540] sm:$0xff]  ;;  %v698_v51 = vld [vmem:[%s3413_s2 + $0x5d0] sm:$0xff]  ;;  %v699_v52 = vld [vmem:[%s3413_s2 + $0x5d8] sm:$0xff] }
  0x3e   : > { %1852 = vmatpush3.bf16.msra.mxu0 %v805_v8  ;;  %v833_v8 = vpack.c.bf16 %v643_v63, %v642_v62  ;;  %v650_v56 = vld [vmem:[%s3413_s2 + $0x450] sm:$0xff]  ;;  %v651_v57 = vld [vmem:[%s3413_s2 + $0x458] sm:$0xff]  ;;  %v669_v62 = vld [vmem:[%s3413_s2 + $0x4e8] sm:$0xff] }
  0x3f   : > { %1874 = vmatpush3.bf16.msra.mxu1 %v821_v9  ;;  %1853 = vmatprep.subr.bf16.mxu0 %v814_v12  ;;  %v849_v9 = vpack.c.bf16 %v675_v1, %v674_v0  ;;  %v842_v12 = vpack.c.bf16 %v661_v3, %v660_v2  ;;  %v700_v63 = vld [vmem:[%s3413_s2 + $0x5e0] sm:$0xff]  ;;  %v701_v0 = vld [vmem:[%s3413_s2 + $0x5e8] sm:$0xff] }
  0x40   : > { %1875 = vmatprep.subr.bf16.mxu1 %v830_v16  ;;  %v858_v16 = vpack.c.bf16 %v693_v6, %v692_v5  ;;  %v652_v3 = vld [vmem:[%s3413_s2 + $0x460] sm:$0xff]  ;;  %v862_v6 = vpack.c.bf16 %v701_v0, %v700_v63  ;;  %v753_v30 = vld [vmem:[%s3413_s2 + $0x788] sm:$0xff] }
  0x41   : > { %v684_v5 = vld [vmem:[%s3413_s2 + $0x560] sm:$0xff]  ;;  %v705_v36 = vld [vmem:[%s3413_s2 + $0x608] sm:$0xff] }
  0x42   : > { %1854 = vmatpush3.bf16.msra.mxu0 %v806_v24  ;;  %v834_v24 = vpack.c.bf16 %v645_v14, %v644_v13  ;;  %v703_v13 = vld [vmem:[%s3413_s2 + $0x5f8] sm:$0xff]  ;;  %v752_v28 = vld [vmem:[%s3413_s2 + $0x780] sm:$0xff]  ;;  %v1254_v61 = vld [vmem:[%s3415_s4 + $0x8] sm:$0xff] }
  0x43   : > { %1876 = vmatpush3.bf16.msra.mxu1 %v822_v26  ;;  %1855 = vmatprep.subr.bf16.mxu0 %v815_v27  ;;  %v850_v26 = vpack.c.bf16 %v677_v17, %v676_v15  ;;  %v843_v27 = vpack.c.bf16 %v663_v19, %v662_v18  ;;  %v654_v17 = vld [vmem:[%s3413_s2 + $0x470] sm:$0xff]  ;;  %v655_v18 = vld [vmem:[%s3413_s2 + $0x478] sm:$0xff]  ;;  %v736_v38 = vld [vmem:[%s3413_s2 + $0x700] sm:$0xff]  ;;  %v888_v39 = vpack.c.bf16 %v753_v30, %v752_v28 }
  0x44   : > { %1877 = vmatprep.subr.bf16.mxu1 %v831_v32  ;;  %v859_v32 = vpack.c.bf16 %v695_v22, %v694_v21  ;;  %v686_v19 = vld [vmem:[%s3413_s2 + $0x570] sm:$0xff]  ;;  %v687_v22 = vld [vmem:[%s3413_s2 + $0x578] sm:$0xff]  ;;  %v708_v0 = vld [vmem:[%s3413_s2 + $0x620] sm:$0xff] }
  0x45   : > { %v712_v28 = vld [vmem:[%s3413_s2 + $0x640] sm:$0xff]  ;;  %v713_v30 = vld [vmem:[%s3413_s2 + $0x648] sm:$0xff] }
  0x46   : > { %1856 = vmatpush3.bf16.msra.mxu0 %v807_v41  ;;  %v851_v41 = vpack.c.bf16 %v679_v34, %v678_v31  ;;  %v839_v31 = vpack.c.bf16 %v655_v18, %v654_v17  ;;  %v855_v34 = vpack.c.bf16 %v687_v22, %v686_v19  ;;  %v743_v17 = vld [vmem:[%s3413_s2 + $0x738] sm:$0xff]  ;;  %v728_v18 = vld [vmem:[%s3413_s2 + $0x6c0] sm:$0xff]  ;;  %v729_v19 = vld [vmem:[%s3413_s2 + $0x6c8] sm:$0xff] }
  0x47   : > { %1878 = vmatpush3.bf16.msra.mxu1 %v823_v44  ;;  %1885 = vmatprep.subr.bf16.mxu0 %v840_v45  ;;  %v648_v44 = vld [vmem:[%s3413_s2 + $0x440] sm:$0xff]  ;;  %v649_v45 = vld [vmem:[%s3413_s2 + $0x448] sm:$0xff] }
  0x48   : > { %1907 = vmatprep.subr.bf16.mxu1 %v856_v50  ;;  %v666_v50 = vld [vmem:[%s3413_s2 + $0x4d0] sm:$0xff]  ;;  %v836_v53 = vpack.c.bf16 %v649_v45, %v648_v44  ;;  %v761_v22 = vld [vmem:[%s3413_s2 + $0x7c8] sm:$0xff] }
  0x49   : > { %1010 = vmatmul.mubr.bf16.vlgmr.msra.gmra.mrb[4].mxu0 %v500_v54  ;;  %v852_v54 = vpack.c.bf16 %v681_v49, %v680_v46  ;;  %v845_v55 = vpack.c.bf16 %v667_v20, %v666_v50  ;;  %v754_v45 = vld [vmem:[%s3413_s2 + $0x790] sm:$0xff]  ;;  %v755_v46 = vld [vmem:[%s3413_s2 + $0x798] sm:$0xff] }
  0x4a   : > { %1050 = vmatmul.mubr.bf16.vlgmr.msra.gmra.mrb[4].mxu1 %v502_v58  ;;  %1886 = vmatpush3.bf16.msra.mxu0 %v832_v59  ;;  %v682_v58 = vld [vmem:[%s3413_s2 + $0x550] sm:$0xff]  ;;  %v861_v59 = vpack.c.bf16 %v699_v52, %v698_v51  ;;  %v707_v52 = vld [vmem:[%s3413_s2 + $0x618] sm:$0xff] }
  0x4b   : > { %1908 = vmatpush3.bf16.msra.mxu1 %v848_v60  ;;  %1887 = vmatprep.subr.bf16.mxu0 %v841_v10  ;;  %v683_v60 = vld [vmem:[%s3413_s2 + $0x558] sm:$0xff]  ;;  %v668_v10 = vld [vmem:[%s3413_s2 + $0x4e0] sm:$0xff]  ;;  %v706_v51 = vld [vmem:[%s3413_s2 + $0x610] sm:$0xff] }
  0x4c   : > { %1909 = vmatprep.subr.bf16.mxu1 %v857_v11  ;;  %1089 = vmatprep.mubr.bf16.mxu0 %v505_v4  ;;  %v837_v11 = vpack.c.bf16 %v651_v57, %v650_v56  ;;  %v853_v1 = vpack.c.bf16 %v683_v60, %v682_v58  ;;  %v846_v2 = vpack.c.bf16 %v669_v62, %v668_v10  ;;  %v653_v4 = vld [vmem:[%s3413_s2 + $0x468] sm:$0xff]  ;;  %v756_v58 = vld [vmem:[%s3413_s2 + $0x7a0] sm:$0xff] }
  0x4d   : > { %1129 = vmatprep.mubr.bf16.mxu1 %v507_v7  ;;  %v685_v7 = vld [vmem:[%s3413_s2 + $0x568] sm:$0xff]  ;;  %v838_v14 = vpack.c.bf16 %v653_v4, %v652_v3  ;;  %v865_v10 = vpack.c.bf16 %v707_v52, %v706_v51  ;;  %v726_v4 = vld [vmem:[%s3413_s2 + $0x6b0] sm:$0xff] }
  0x4e   : > { %1888 = vmatpush3.bf16.msra.mxu0 %v833_v8  ;;  %v670_v8 = vld [vmem:[%s3413_s2 + $0x4f0] sm:$0xff]  ;;  %v854_v15 = vpack.c.bf16 %v685_v7, %v684_v5  ;;  %v725_v56 = vld [vmem:[%s3413_s2 + $0x6a8] sm:$0xff]  ;;  %v727_v5 = vld [vmem:[%s3413_s2 + $0x6b8] sm:$0xff] }
  0x4f   : > { %1910 = vmatpush3.bf16.msra.mxu1 %v849_v9  ;;  %1889 = vmatprep.subr.bf16.mxu0 %v842_v12  ;;  %v671_v9 = vld [vmem:[%s3413_s2 + $0x4f8] sm:$0xff]  ;;  %v702_v12 = vld [vmem:[%s3413_s2 + $0x5f0] sm:$0xff]  ;;  %v741_v3 = vld [vmem:[%s3413_s2 + $0x728] sm:$0xff] }
  0x50   : > { %1911 = vmatprep.subr.bf16.mxu1 %v858_v16  ;;  %v847_v16 = vpack.c.bf16 %v671_v9, %v670_v8  ;;  %v863_v21 = vpack.c.bf16 %v703_v13, %v702_v12  ;;  %v759_v7 = vld [vmem:[%s3413_s2 + $0x7b8] sm:$0xff]  ;;  %v875_v12 = vpack.c.bf16 %v727_v5, %v726_v4  ;;  %v710_v13 = vld [vmem:[%s3413_s2 + $0x630] sm:$0xff]  ;;  %v467_v4 = vrot.slane %v2777_v37, %v434_v23  ;;  %v1253_v23 = vld [vmem:[%s3415_s4] sm:$0xff] }
  0x52   : > { %1890 = vmatpush3.bf16.msra.mxu0 %v834_v24  ;;  %v720_v24 = vld [vmem:[%s3413_s2 + $0x680] sm:$0xff] }
  0x53   : > { %1912 = vmatpush3.bf16.msra.mxu1 %v850_v26  ;;  %1891 = vmatprep.subr.bf16.mxu0 %v843_v27  ;;  %v721_v26 = vld [vmem:[%s3413_s2 + $0x688] sm:$0xff]  ;;  %v451_v27 = vrot.slane %v2777_v37, %v418_v29  ;;  %v704_v29 = vld [vmem:[%s3413_s2 + $0x600] sm:$0xff] }
  0x54   : > { %1913 = vmatprep.subr.bf16.mxu1 %v859_v32  ;;  %v459_v32 = vrot.slane %v2777_v37, %v426_v33  ;;  %v872_v35 = vpack.c.bf16 %v721_v26, %v720_v24  ;;  %v737_v33 = vld [vmem:[%s3413_s2 + $0x708] sm:$0xff]  ;;  %v864_v50 = vpack.c.bf16 %v705_v36, %v704_v29  ;;  %v731_v29 = vld [vmem:[%s3413_s2 + $0x6d8] sm:$0xff]  ;;  %v762_v36 = vld [vmem:[%s3413_s2 + $0x7d0] sm:$0xff] }
  0x55   : > { %v504_v44 = vpack.c.bf16 %v451_v27, %v451_v27  ;;  %v880_v20 = vpack.c.bf16 %v737_v33, %v736_v38  ;;  %v876_v27 = vpack.c.bf16 %v729_v19, %v728_v18  ;;  %v763_v38 = vld [vmem:[%s3413_s2 + $0x7d8] sm:$0xff] }
  0x56   : > { %1892 = vmatpush3.bf16.msra.mxu0 %v835_v40  ;;  %v722_v40 = vld [vmem:[%s3413_s2 + $0x690] sm:$0xff]  ;;  %v506_v49 = vpack.c.bf16 %v459_v32, %v459_v32 }
  0x57   : > { %1914 = vmatpush3.bf16.msra.mxu1 %v851_v41  ;;  %1893 = vmatprep.subr.bf16.mxu0 %v844_v42  ;;  %v723_v41 = vld [vmem:[%s3413_s2 + $0x698] sm:$0xff]  ;;  %v471_v42 = vrot.slane %v2777_v37, %v438_v43 }
  0x58   : > { %1915 = vmatprep.subr.bf16.mxu1 %v860_v48  ;;  %v479_v48 = vrot.slane %v2777_v37, %v446_v47  ;;  %v873_v43 = vpack.c.bf16 %v723_v41, %v722_v40  ;;  %v889_v47 = vpack.c.bf16 %v755_v46, %v754_v45  ;;  %v714_v41 = vld [vmem:[%s3413_s2 + $0x650] sm:$0xff]  ;;  %v893_v45 = vpack.c.bf16 %v763_v38, %v762_v36  ;;  %v747_v46 = vld [vmem:[%s3413_s2 + $0x758] sm:$0xff] }
  0x59   : > { %v509_v57 = vpack.c.bf16 %v471_v42, %v471_v42  ;;  %v715_v42 = vld [vmem:[%s3413_s2 + $0x658] sm:$0xff] }
  0x5a   : > { %1894 = vmatpush3.bf16.msra.mxu0 %v836_v53  ;;  %v738_v53 = vld [vmem:[%s3413_s2 + $0x710] sm:$0xff]  ;;  %v511_v60 = vpack.c.bf16 %v479_v48, %v479_v48  ;;  %v732_v48 = vld [vmem:[%s3413_s2 + $0x6e0] sm:$0xff] }
  0x5b   : > { %1916 = vmatpush3.bf16.msra.mxu1 %v852_v54  ;;  %1895 = vmatprep.subr.bf16.mxu0 %v845_v55  ;;  %v739_v54 = vld [vmem:[%s3413_s2 + $0x718] sm:$0xff]  ;;  %v724_v55 = vld [vmem:[%s3413_s2 + $0x6a0] sm:$0xff] }
  0x5c   : > { %1917 = vmatprep.subr.bf16.mxu1 %v861_v59  ;;  %v757_v59 = vld [vmem:[%s3413_s2 + $0x7a8] sm:$0xff]  ;;  %v881_v62 = vpack.c.bf16 %v739_v54, %v738_v53  ;;  %v874_v63 = vpack.c.bf16 %v725_v56, %v724_v55  ;;  %v716_v53 = vld [vmem:[%s3413_s2 + $0x660] sm:$0xff] }
  0x5d   : > { %v748_v54 = vld [vmem:[%s3413_s2 + $0x760] sm:$0xff]  ;;  %v749_v56 = vld [vmem:[%s3413_s2 + $0x768] sm:$0xff] }
  0x5e   : > { %1896 = vmatpush3.bf16.msra.mxu0 %v837_v11  ;;  %v709_v11 = vld [vmem:[%s3413_s2 + $0x628] sm:$0xff] }
  0x5f   : > { %1918 = vmatpush3.bf16.msra.mxu1 %v853_v1  ;;  %1897 = vmatprep.subr.bf16.mxu0 %v846_v2  ;;  %v740_v1 = vld [vmem:[%s3413_s2 + $0x720] sm:$0xff]  ;;  %v890_v2 = vpack.c.bf16 %v757_v59, %v756_v58  ;;  %v866_v8 = vpack.c.bf16 %v709_v11, %v708_v0  ;;  %v735_v58 = vld [vmem:[%s3413_s2 + $0x6f8] sm:$0xff]  ;;  %v766_v59 = vld [vmem:[%s3413_s2 + $0x7f0] sm:$0xff] }
  0x60   : > { %1919 = vmatprep.subr.bf16.mxu1 %v862_v6  ;;  %v758_v6 = vld [vmem:[%s3413_s2 + $0x7b0] sm:$0xff]  ;;  %v882_v9 = vpack.c.bf16 %v741_v3, %v740_v1  ;;  %v719_v11 = vld [vmem:[%s3413_s2 + $0x678] sm:$0xff] }
  0x61   : > { %v718_v0 = vld [vmem:[%s3413_s2 + $0x670] sm:$0xff]  ;;  %v751_v3 = vld [vmem:[%s3413_s2 + $0x778] sm:$0xff] }
  0x62   : > { %1898 = vmatpush3.bf16.msra.mxu0 %v838_v14  ;;  %v711_v14 = vld [vmem:[%s3413_s2 + $0x638] sm:$0xff]  ;;  %v871_v5 = vpack.c.bf16 %v719_v11, %v718_v0 }
  0x63   : > { %1920 = vmatpush3.bf16.msra.mxu1 %v854_v15  ;;  %1899 = vmatprep.subr.bf16.mxu0 %v847_v16  ;;  %v742_v15 = vld [vmem:[%s3413_s2 + $0x730] sm:$0xff]  ;;  %v891_v16 = vpack.c.bf16 %v759_v7, %v758_v6  ;;  %v867_v24 = vpack.c.bf16 %v711_v14, %v710_v13  ;;  %v475_v6 = vrot.slane %v2777_v37, %v442_v25  ;;  %v2258_v37 = vmov 0.0|0.0   ;;  %v1256_v14 = vld [vmem:[%s3415_s4 + $0x18] sm:$0xff] }
  0x64   : > { %1921 = vmatprep.subr.bf16.mxu1 %v863_v21  ;;  %v760_v21 = vld [vmem:[%s3413_s2 + $0x7c0] sm:$0xff]  ;;  %v883_v26 = vpack.c.bf16 %v743_v17, %v742_v15  ;;  %v1255_v25 = vld [vmem:[%s3415_s4 + $0x10] sm:$0xff]  ;;  %v2150_v13 = vpack.c.bf16 %v1254_v61, %v1253_v23  ;;  %v1258_v17 = vld [vmem:[%s3415_s4 + $0x28] sm:$0xff] }
  0x65   : > { %v892_v32 = vpack.c.bf16 %v761_v22, %v760_v21  ;;  %v2153_v15 = vpack.c.bf16 %v1256_v14, %v1255_v25  ;;  %v896_v22 = vld [vmem:[%s3414_s3] sm:$0x1] }
  0x66   : > { %1900 = vmatpush3.bf16.msra.mxu0 %v839_v31  ;;  %v744_v31 = vld [vmem:[%s3413_s2 + $0x740] sm:$0xff] }
  0x67   : > { %1922 = vmatpush3.bf16.msra.mxu1 %v855_v34  ;;  %1929 = vmatprep.subr.bf16.mxu0 %v872_v35  ;;  %v745_v34 = vld [vmem:[%s3413_s2 + $0x748] sm:$0xff]  ;;  %v730_v35 = vld [vmem:[%s3413_s2 + $0x6d0] sm:$0xff] }
  0x68   : > { %1951 = vmatprep.subr.bf16.mxu1 %v888_v39  ;;  %v868_v39 = vpack.c.bf16 %v713_v30, %v712_v28  ;;  %v884_v33 = vpack.c.bf16 %v745_v34, %v744_v31  ;;  %v877_v40 = vpack.c.bf16 %v731_v29, %v730_v35 }
  0x69   : > { %1090 = vmatmul.mubr.bf16.vlgmr.msra.gmra.mrb[8].mxu0 %v504_v44  ;;  %v746_v44 = vld [vmem:[%s3413_s2 + $0x750] sm:$0xff] }
  0x6a   : > { %1130 = vmatmul.mubr.bf16.vlgmr.msra.gmra.mrb[8].mxu1 %v506_v49  ;;  %1930 = vmatpush3.bf16.msra.mxu0 %v864_v50  ;;  %v733_v49 = vld [vmem:[%s3413_s2 + $0x6e8] sm:$0xff]  ;;  %v764_v50 = vld [vmem:[%s3413_s2 + $0x7e0] sm:$0xff]  ;;  %v885_v51 = vpack.c.bf16 %v747_v46, %v746_v44 }
  0x6b   : > { %1952 = vmatpush3.bf16.msra.mxu1 %v880_v20  ;;  %1931 = vmatprep.subr.bf16.mxu0 %v873_v43  ;;  %v765_v20 = vld [vmem:[%s3413_s2 + $0x7e8] sm:$0xff]  ;;  %v869_v43 = vpack.c.bf16 %v715_v42, %v714_v41  ;;  %v878_v52 = vpack.c.bf16 %v733_v49, %v732_v48 }
  0x6c   : > { %1953 = vmatprep.subr.bf16.mxu1 %v889_v47  ;;  %1169 = vmatprep.mubr.bf16.mxu0 %v509_v57  ;;  %v717_v47 = vld [vmem:[%s3413_s2 + $0x668] sm:$0xff]  ;;  %v894_v55 = vpack.c.bf16 %v765_v20, %v764_v50  ;;  %v734_v57 = vld [vmem:[%s3413_s2 + $0x6f0] sm:$0xff] }
  0x6d   : > { %1209 = vmatprep.mubr.bf16.mxu1 %v511_v60  ;;  %v767_v60 = vld [vmem:[%s3413_s2 + $0x7f8] sm:$0xff] }
  0x6e   : > { %1932 = vmatpush3.bf16.msra.mxu0 %v865_v10  ;;  %v870_v10 = vpack.c.bf16 %v717_v47, %v716_v53  ;;  %v895_v1 = vpack.c.bf16 %v767_v60, %v766_v59  ;;  %v1259_v59 = vld [vmem:[%s3415_s4 + $0x30] sm:$0xff]  ;;  %v1260_v60 = vld [vmem:[%s3415_s4 + $0x38] sm:$0xff] }
  0x6f   : > { %1954 = vmatpush3.bf16.msra.mxu1 %v881_v62  ;;  %1933 = vmatprep.subr.bf16.mxu0 %v874_v63  ;;  %v886_v62 = vpack.c.bf16 %v749_v56, %v748_v54  ;;  %v879_v63 = vpack.c.bf16 %v735_v58, %v734_v57 }
  0x70   : > { %1955 = vmatprep.subr.bf16.mxu1 %v890_v2  ;;  %v750_v2 = vld [vmem:[%s3413_s2 + $0x770] sm:$0xff] }
  0x71   : > { %v887_v7 = vpack.c.bf16 %v751_v3, %v750_v2 }
  0x72   : > { %1934 = vmatpush3.bf16.msra.mxu0 %v866_v8  ;;  %v508_v8 = vpack.c.bf16 %v467_v4, %v467_v4 }
  0x73   : > { %1956 = vmatpush3.bf16.msra.mxu1 %v882_v9  ;;  %1935 = vmatprep.subr.bf16.mxu0 %v875_v12  ;;  %v510_v9 = vpack.c.bf16 %v475_v6, %v475_v6  ;;  %v2257_v12 = vmov 0.0   ;;  %v1263_v6 = vld [vmem:[%s3415_s4 + $0x50] sm:$0xff] }
  0x74   : > { %1957 = vmatprep.subr.bf16.mxu1 %v891_v16  ;;  %1218 = vst [vmem:[#allocation2] sm:$0xff] %v2257_v12  ;;  %v1257_v16 = vld [vmem:[%s3415_s4 + $0x20] sm:$0xff] }
  0x75   : > { %v2156_v18 = vpack.c.bf16 %v1258_v17, %v1257_v16  ;;  %v1266_v16 = vld [vmem:[%s3415_s4 + $0x68] sm:$0xff] }
  0x76   : > { %1936 = vmatpush3.bf16.msra.mxu0 %v867_v24 }
  0x77   : > { %1958 = vmatpush3.bf16.msra.mxu1 %v883_v26  ;;  %1937 = vmatprep.subr.bf16.mxu0 %v876_v27 }
  0x78   : > { %1959 = vmatprep.subr.bf16.mxu1 %v892_v32 }
  0x7a   : > { %1938 = vmatpush3.bf16.msra.mxu0 %v868_v39 }
  0x7b   : > { %1960 = vmatpush3.bf16.msra.mxu1 %v884_v33  ;;  %1939 = vmatprep.subr.bf16.mxu0 %v877_v40 }
  0x7c   : > { %1961 = vmatprep.subr.bf16.mxu1 %v893_v45 }
  0x7e   : > { %1940 = vmatpush3.bf16.msra.mxu0 %v869_v43 }
  0x7f   : > { %1962 = vmatpush3.bf16.msra.mxu1 %v885_v51  ;;  %1941 = vmatprep.subr.bf16.mxu0 %v878_v52 }
  0x80   : > { %1963 = vmatprep.subr.bf16.mxu1 %v894_v55 }
  0x82   : > { %1942 = vmatpush3.bf16.msra.mxu0 %v870_v10  ;;  %v2159_v10 = vpack.c.bf16 %v1260_v60, %v1259_v59  ;;  %v1508_v60 = vld [vmem:[%s3417_s6 + $0x30] sm:$0xff] }
  0x83   : > { %1964 = vmatpush3.bf16.msra.mxu1 %v886_v62  ;;  %1943 = vmatprep.subr.bf16.mxu0 %v879_v63  ;;  %v1261_v62 = vld [vmem:[%s3415_s4 + $0x40] sm:$0xff]  ;;  %v1262_v63 = vld [vmem:[%s3415_s4 + $0x48] sm:$0xff] }
  0x84   : > { %1965 = vmatprep.subr.bf16.mxu1 %v895_v1  ;;  %v2162_v0 = vpack.c.bf16 %v1262_v63, %v1261_v62  ;;  %v1510_v62 = vld [vmem:[%s3417_s6 + $0x40] sm:$0xff]  ;;  %v1511_v63 = vld [vmem:[%s3417_s6 + $0x48] sm:$0xff] }
  0x86   : > { %1944 = vmatpush3.bf16.msra.mxu0 %v871_v5 }
  0x87   : > { %1966 = vmatpush3.bf16.msra.mxu1 %v887_v7  ;;  %2149 = vmatprep.subr.bf16.mxu0 %v2258_v37  ;;  %v1264_v7 = vld [vmem:[%s3415_s4 + $0x58] sm:$0xff] }
  0x88   : > { %2173 = vmatprep.subr.bf16.mxu1 %v2258_v37  ;;  %v2165_v61 = vpack.c.bf16 %v1264_v7, %v1263_v6  ;;  %v1516_v6 = vld [vmem:[%s3417_s6 + $0x70] sm:$0xff]  ;;  %v1517_v7 = vld [vmem:[%s3417_s6 + $0x78] sm:$0xff] }
  0x89   : > { %1170 = vmatmul.mubr.bf16.vlgmr.msra.gmra.mrb[12].mxu0 %v508_v8 }
  0x8a   : > { %1210 = vmatmul.mubr.bf16.vlgmr.msra.gmra.mrb[12].mxu1 %v510_v9  ;;  %2151 = vmatpush3.bf16.msra.mxu0 %v2150_v13 }
  0x8b   : > { %2152 = vmatprep.subr.bf16.mxu0 %v2258_v37  ;;  %2062 = vmatprep.mubr.msk.f32.mxu0 %vm2261_vm1, %v2257_v12 }
  0x8c   : > { %2069 = vmatprep.mubr.msk.f32.mxu1 %vm2261_vm1, %v2257_v12 }
  0x8e   : > { %2154 = vmatpush3.bf16.msra.mxu0 %v2153_v15  ;;  %v1265_v15 = vld [vmem:[%s3415_s4 + $0x60] sm:$0xff] }
  0x8f   : > { %2155 = vmatprep.subr.bf16.mxu0 %v2258_v37  ;;  %v2168_v17 = vpack.c.bf16 %v1266_v16, %v1265_v15  ;;  %v1600_v15 = vld [vmem:[%s3419_s8 + $0x20] sm:$0xff]  ;;  %v1601_v16 = vld [vmem:[%s3419_s8 + $0x28] sm:$0xff] }
  0x92   : > { %2157 = vmatpush3.bf16.msra.mxu0 %v2156_v18  ;;  %v1267_v18 = vld [vmem:[%s3415_s4 + $0x70] sm:$0xff] }
  0x93   : > { %2158 = vmatprep.subr.bf16.mxu0 %v2258_v37 }
  0x96   : > { %2160 = vmatpush3.bf16.msra.mxu0 %v2159_v10 }
  0x97   : > { %2161 = vmatprep.subr.bf16.mxu0 %v2258_v37 }
  0x9a   : > { %2163 = vmatpush3.bf16.msra.mxu0 %v2162_v0  ;;  %v2192_v0 = vpack.c.bf16 %v1511_v63, %v1510_v62 }
  0x9b   : > { %2164 = vmatprep.subr.bf16.mxu0 %v2258_v37 }
  0x9e   : > { %2166 = vmatpush3.bf16.msra.mxu0 %v2165_v61  ;;  %v1598_v61 = vld [vmem:[%s3419_s8 + $0x10] sm:$0xff] }
  0x9f   : > { %2167 = vmatprep.subr.bf16.mxu0 %v2258_v37 }
  0xa2   : > { %2169 = vmatpush3.bf16.msra.mxu0 %v2168_v17  ;;  %v2210_v17 = vpack.c.bf16 %v1601_v16, %v1600_v15 }
  0xa3   : > { %2170 = vmatprep.subr.bf16.mxu0 %v2258_v37 }
  0xfc   : > { %v1813_v19 = vpop.f32.mrb[0].mxu0 }
  0xfd   : > { %v1835_v21 = vpop.f32.mrb[0].mxu1  ;;  %v1814_v24 = vpop.f32.mrb[1].mxu0 }
  0xfe   : > { %v1815_v26 = vadd.f32 %v1814_v24, %v1813_v19  ;;  %v1836_v27 = vpop.f32.mrb[1].mxu1  ;;  %v1816_v28 = vpop.f32.mrb[2].mxu0  ;;  %v1268_v19 = vld [vmem:[%s3415_s4 + $0x78] sm:$0xff]  ;;  %v1252_v24 = vld [vmem:[%s403_s25 + $0x8] sm:$0xff] }
  0xff   : > { %v1837_v30 = vadd.f32 %v1836_v27, %v1835_v21  ;;  %v1838_v31 = vpop.f32.mrb[2].mxu1  ;;  %v1817_v32 = vpop.f32.mrb[3].mxu0  ;;  %v2171_v21 = vpack.c.bf16 %v1268_v19, %v1267_v18  ;;  %v1602_v18 = vld [vmem:[%s3419_s8 + $0x30] sm:$0xff]  ;;  %v1603_v19 = vld [vmem:[%s3419_s8 + $0x38] sm:$0xff] }
 0x100   : > { %v932_v34 = vadd.f32 %v1815_v26, %v896_v22  ;;  %v1839_v35 = vpop.f32.mrb[3].mxu1  ;;  %v1251_v22 = vld [vmem:[%s403_s25] sm:$0xff] }
 0x101   : > { %2172 = vmatpush3.bf16.msra.mxu0 %v2171_v21  ;;  %v2174_v26 = vpack.c.bf16 %v1252_v24, %v1251_v22  ;;  %v2213_v21 = vpack.c.bf16 %v1603_v19, %v1602_v18  ;;  %v1604_v22 = vld [vmem:[%s3419_s8 + $0x40] sm:$0xff]  ;;  %v1605_v24 = vld [vmem:[%s3419_s8 + $0x48] sm:$0xff] }
 0x102   : > { %v972_v29 = vadd.f32 %v1837_v30, %v932_v34  ;;  %2203 = vmatprep.subr.bf16.mxu0 %v2258_v37 }
 0x103   : > { %2175 = vmatpush3.bf16.xpose.msra.mxu1 %v2174_v26 }
 0x104   : > { %2176 = vmatprep.subr.bf16.mxu1 %v2258_v37 }
 0x11c   : > { %v1857_v36 = vpop.f32.mrb[4].mxu0 }
 0x11d   : > { %v1879_v38 = vpop.f32.mrb[4].mxu1  ;;  %v1858_v39 = vpop.f32.mrb[5].mxu0 }
 0x11e   : > { %v1859_v33 = vadd.f32 %v1858_v39, %v1857_v36  ;;  %v1880_v40 = vpop.f32.mrb[5].mxu1  ;;  %v1860_v41 = vpop.f32.mrb[6].mxu0  ;;  %v1790_v36 = vld [vmem:[%s3416_s5] ss:$0 sm:$0xff] }
 0x11f   : > { %v1881_v42 = vadd.f32 %v1880_v40, %v1879_v38  ;;  %v1882_v44 = vpop.f32.mrb[6].mxu1  ;;  %v1861_v45 = vpop.f32.mrb[7].mxu0 }
 0x120   : > { %v1012_v46 = vadd.f32 %v1859_v33, %v972_v29  ;;  %v1883_v48 = vpop.f32.mrb[7].mxu1 }
 0x122   : > { %v1052_v49 = vadd.f32 %v1881_v42, %v1012_v46 }
 0x13c   : > { %v1901_v50 = vpop.f32.mrb[8].mxu0 }
 0x13d   : > { %v1923_v20 = vpop.f32.mrb[8].mxu1  ;;  %v1902_v43 = vpop.f32.mrb[9].mxu0 }
 0x13e   : > { %v1903_v51 = vadd.f32 %v1902_v43, %v1901_v50  ;;  %v1924_v52 = vpop.f32.mrb[9].mxu1  ;;  %v1904_v53 = vpop.f32.mrb[10].mxu0  ;;  %v1502_v43 = vld [vmem:[%s3417_s6] sm:$0xff] }
 0x13f   : > { %v1925_v47 = vadd.f32 %v1924_v52, %v1923_v20  ;;  %v1926_v54 = vpop.f32.mrb[10].mxu1  ;;  %v1905_v55 = vpop.f32.mrb[11].mxu0 }
 0x140   : > { %v1092_v56 = vadd.f32 %v1903_v51, %v1052_v49  ;;  %v1927_v57 = vpop.f32.mrb[11].mxu1  ;;  %v1503_v51 = vld [vmem:[%s3417_s6 + $0x8] sm:$0xff]  ;;  %v1504_v54 = vld [vmem:[%s3417_s6 + $0x10] sm:$0xff]  ;;  %v1505_v55 = vld [vmem:[%s3417_s6 + $0x18] sm:$0xff] }
 0x141   : > { %v2180_v53 = vpack.c.bf16 %v1503_v51, %v1502_v43  ;;  %v1506_v57 = vld [vmem:[%s3417_s6 + $0x20] sm:$0xff] }
 0x142   : > { %v1132_v58 = vadd.f32 %v1925_v47, %v1092_v56  ;;  %v2183_v56 = vpack.c.bf16 %v1505_v55, %v1504_v54 }
 0x15c   : > { %v1945_v11 = vpop.f32.mrb[12].mxu0 }
 0x15d   : > { %v1967_v1 = vpop.f32.mrb[12].mxu1  ;;  %v1946_v2 = vpop.f32.mrb[13].mxu0 }
 0x15e   : > { %v1947_v3 = vadd.f32 %v1946_v2, %v1945_v11  ;;  %v1968_v4 = vpop.f32.mrb[13].mxu1  ;;  %v1948_v5 = vpop.f32.mrb[14].mxu0  ;;  %v1512_v11 = vld [vmem:[%s3417_s6 + $0x50] sm:$0xff] }
 0x15f   : > { %v1969_v8 = vadd.f32 %v1968_v4, %v1967_v1  ;;  %v1970_v9 = vpop.f32.mrb[14].mxu1  ;;  %v1949_v23 = vpop.f32.mrb[15].mxu0  ;;  %v1513_v1 = vld [vmem:[%s3417_s6 + $0x58] sm:$0xff]  ;;  %v1515_v4 = vld [vmem:[%s3417_s6 + $0x68] sm:$0xff] }
 0x160   : > { %v1172_v25 = vadd.f32 %v1947_v3, %v1132_v58  ;;  %v1971_v13 = vpop.f32.mrb[15].mxu1  ;;  %v1507_v58 = vld [vmem:[%s3417_s6 + $0x28] sm:$0xff]  ;;  %v2195_v2 = vpack.c.bf16 %v1513_v1, %v1512_v11  ;;  %v1514_v3 = vld [vmem:[%s3417_s6 + $0x60] sm:$0xff] }
 0x161   : > { %v2186_v59 = vpack.c.bf16 %v1507_v58, %v1506_v57  ;;  %v2198_v5 = vpack.c.bf16 %v1515_v4, %v1514_v3  ;;  %v1596_v9 = vld [vmem:[%s3419_s8] sm:$0xff]  ;;  %v1597_v23 = vld [vmem:[%s3419_s8 + $0x8] sm:$0xff]  ;;  %v1599_v13 = vld [vmem:[%s3419_s8 + $0x18] sm:$0xff] }
 0x162   : > { %v1212_v14 = vadd.f32 %v1969_v8, %v1172_v25  ;;  %v2201_v8 = vpack.c.bf16 %v1517_v7, %v1516_v6  ;;  %v2204_v25 = vpack.c.bf16 %v1597_v23, %v1596_v9 }
 0x164   : > { %1217 = vst [vmem:[%s406_s26] sm:$0x1] %v1212_v14  ;;  %1230 = vrot.lane.b32.xlu1 %v1212_v14, %s2259_s16  ;;  %1222 = vrot.lane.b32.xlu0 %v1212_v14, %s2260_s19  ;;  %1220 = vst.msk [vmem:[#allocation2] sm:$0x1] %vm1219_vm0, %v1212_v14  ;;  %s2264_s26 = smov 104  }
 0x168   : > { %1234 = vrot.lane.b32.xlu1 %v1212_v14, %s2262_s20  ;;  %1226 = vrot.lane.b32.xlu0 %v1212_v14, %s2263_s22 }
 0x16c   : > { %1242 = vrot.lane.b32.xlu1 %v1212_v14, %s2264_s26  ;;  %1238 = vrot.lane.b32.xlu0 %v1212_v14, %s2265_s27 }
 0x170   : > { %1246 = vrot.lane.b32.xlu0 %v1212_v14, %s2266_s28  ;;  %v2207_v14 = vpack.c.bf16 %v1599_v13, %v1598_v61 }
 0x1d6   : > { %v1231_v27 = vpop.permute.xlu1 %1230  ;;  %v1223_v28 = vpop.permute.xlu0 %1222 }
 0x1d7   : > { %1233 = vst.msk [vmem:[#allocation2 + $0x3] sm:$0x1] %vm1219_vm0, %v1231_v27  ;;  %1225 = vst.msk [vmem:[#allocation2 + $0x1] sm:$0x1] %vm1219_vm0, %v1223_v28  ;;  %v1606_v27 = vld [vmem:[%s3419_s8 + $0x50] sm:$0xff]  ;;  %v1607_v28 = vld [vmem:[%s3419_s8 + $0x58] sm:$0xff] }
 0x1da   : > { %v1235_v30 = vpop.permute.xlu1 %1234  ;;  %v1227_v31 = vpop.permute.xlu0 %1226 }
 0x1db   : > { %1237 = vst.msk [vmem:[#allocation2 + $0x4] sm:$0x1] %vm1219_vm0, %v1235_v30  ;;  %1229 = vst.msk [vmem:[#allocation2 + $0x2] sm:$0x1] %vm1219_vm0, %v1227_v31  ;;  %v2219_v30 = vpack.c.bf16 %v1607_v28, %v1606_v27  ;;  %v1608_v31 = vld [vmem:[%s3419_s8 + $0x60] sm:$0xff] }
 0x1de   : > { %v1243_v32 = vpop.permute.xlu1 %1242  ;;  %v1239_v34 = vpop.permute.xlu0 %1238 }
 0x1df   : > { %1245 = vst.msk [vmem:[#allocation2 + $0x6] sm:$0x1] %vm1219_vm0, %v1243_v32  ;;  %1241 = vst.msk [vmem:[#allocation2 + $0x5] sm:$0x1] %vm1219_vm0, %v1239_v34  ;;  %v1609_v32 = vld [vmem:[%s3419_s8 + $0x68] sm:$0xff] }
 0x1e0   : > { %v2222_v34 = vpack.c.bf16 %v1609_v32, %v1608_v31 }
 0x1e2   : > { %v1247_v35 = vpop.permute.xlu0 %1246 }
 0x1e3   : > { %1249 = vst.msk [vmem:[#allocation2 + $0x7] sm:$0x1] %vm1219_vm0, %v1247_v35 }
 0x1ea   : > { %v3271_v29 = vld [vmem:[#allocation2] sm:$0xff] }
 0x1eb   : > { %2063 = vmatmul.mubr.f32.vlgmr.msra.gmra.mrb[16].mxu0 %v3271_v29 }
 0x1ec   : > { %2146 = vmatprep.mubr.msk.f32.mxu0 %vm2261_vm1, %v2257_v12  ;;  %2205 = vmatpush3.bf16.msra.mxu0 %v2204_v25 }
 0x1ed   : > { %2206 = vmatprep.subr.bf16.mxu0 %v2258_v37 }
 0x1f0   : > { %2208 = vmatpush3.bf16.msra.mxu0 %v2207_v14 }
 0x1f1   : > { %2209 = vmatprep.subr.bf16.mxu0 %v2258_v37 }
 0x1f4   : > { %2211 = vmatpush3.bf16.msra.mxu0 %v2210_v17 }
 0x1f5   : > { %2212 = vmatprep.subr.bf16.mxu0 %v2258_v37 }
 0x1f8   : > { %2214 = vmatpush3.bf16.msra.mxu0 %v2213_v21 }
 0x1f9   : > { %2215 = vmatprep.subr.bf16.mxu0 %v2258_v37 }
 0x2be   : > { %v1342_v38 = vpop.f32.mrb[16].mxu0 }
 0x2bf   : > { %v1343_v39 = vadd.f32 %v1790_v36, %v1342_v38  ;;  %v2064_v33 = vpop.f32.mrb[17].mxu0  ;;  %v1610_v38 = vld [vmem:[%s3419_s8 + $0x70] sm:$0xff] }
 0x2c1   : > { %2070 = vmatmul.mubr.f32.vlgmr.msra.gmra.mrb[16].mxu1 %v1343_v39  ;;  %v1611_v39 = vld [vmem:[%s3419_s8 + $0x78] sm:$0xff] }
 0x2c2   : > { %2178 = vmatpush3.bf16.msra.mxu1 %v2174_v26  ;;  %2076 = vmatprep.mubr.msk.f32.mxu1 %vm2261_vm1, %v2257_v12  ;;  %v2216_v26 = vpack.c.bf16 %v1605_v24, %v1604_v22  ;;  %v2225_v33 = vpack.c.bf16 %v1611_v39, %v1610_v38 }
 0x2c3   : > { %2179 = vmatprep.subr.bf16.mxu1 %v2258_v37 }
 0x2c4   : > { %2217 = vmatpush3.bf16.msra.mxu0 %v2216_v26 }
 0x2c5   : > { %2218 = vmatprep.subr.bf16.mxu0 %v2258_v37 }
 0x2c8   : > { %2220 = vmatpush3.bf16.msra.mxu0 %v2219_v30 }
 0x2c9   : > { %2221 = vmatprep.subr.bf16.mxu0 %v2258_v37 }
 0x2cc   : > { %2223 = vmatpush3.bf16.msra.mxu0 %v2222_v34 }
 0x2cd   : > { %2224 = vmatprep.subr.bf16.mxu0 %v2258_v37 }
 0x2d0   : > { %2226 = vmatpush3.bf16.msra.mxu0 %v2225_v33 }
 0x394   : > { %v1412_v40 = vpop.f32.mrb[16].mxu1 }
 0x395   : > { %v1416_v41 = vmul.f32 0.17677669, %v1412_v40  ;;  %v2071_v42 = vpop.f32.mrb[17].mxu1  ;;  %v1792_v40 = vld [vmem:[%s3418_s7] ss:$0 sm:$0xff] }
 0x397   : > { %v1418_v44 = vsel %vm1417_vm2, %v1416_v41, -inf }
 0x398   : > { %1419 = vmax.xlane.f32.xlu1 %v1418_v44 }
 0x425   : > { %v1420_v45 = vpop.xlane.xlu1 %1419 }
 0x426   : > { %v1421_v46 = vsub.f32 %v1416_v41, %v1420_v45  ;;  %v1793_v45 = vld [vmem:[%s3420_s9] ss:$0 sm:$0xff] }
 0x428   : > { %v1422_v48 = vmul.f32 1.442695, %v1421_v46 }
 0x42a   : > { %2245 = vpow2.f32 %v1422_v48 }
 0x434   : > { %v2246_v49 = vpop.eup %2245 }
 0x435   : > { %v1424_v50 = vsel %vm1417_vm2, %v2246_v49, 0.0 }
 0x436   : > { %1425 = vadd.xlane.f32.xlu0 %v1424_v50 }
 0x4c3   : > { %v1426_v20 = vpop.xlane.xlu0 %1425 }
 0x4c4   : > { %2247 = vrcp.f32 %v1426_v20 }
 0x4ce   : > { %v2248_v52 = vpop.eup %2247 }
 0x4cf   : > { %v1428_v47 = vmul.f32 %v2248_v52, %v2246_v49 }
 0x4d1   : > { %2077 = vmatmul.mubr.msk.f32.vlgmr.msra.gmra.mrb[18].mxu1 %vm1417_vm2, %v1428_v47 }
 0x4d2   : > { %2181 = vmatpush3.bf16.msra.mxu1 %v2180_v53  ;;  %2111 = vmatprep.mubr.msk.f32.mxu1 %vm2261_vm1, %v2257_v12  ;;  %v1509_v12 = vld [vmem:[%s3417_s6 + $0x38] sm:$0xff] }
 0x4d3   : > { %2182 = vmatprep.subr.bf16.mxu1 %v2258_v37  ;;  %v2189_v10 = vpack.c.bf16 %v1509_v12, %v1508_v60 }
 0x4d6   : > { %2184 = vmatpush3.bf16.msra.mxu1 %v2183_v56 }
 0x4d7   : > { %2185 = vmatprep.subr.bf16.mxu1 %v2258_v37 }
 0x4da   : > { %2187 = vmatpush3.bf16.msra.mxu1 %v2186_v59 }
 0x4db   : > { %2188 = vmatprep.subr.bf16.mxu1 %v2258_v37 }
 0x4de   : > { %2190 = vmatpush3.bf16.msra.mxu1 %v2189_v10 }
 0x4df   : > { %2191 = vmatprep.subr.bf16.mxu1 %v2258_v37 }
 0x4e2   : > { %2193 = vmatpush3.bf16.msra.mxu1 %v2192_v0 }
 0x4e3   : > { %2194 = vmatprep.subr.bf16.mxu1 %v2258_v37 }
 0x4e6   : > { %2196 = vmatpush3.bf16.msra.mxu1 %v2195_v2 }
 0x4e7   : > { %2197 = vmatprep.subr.bf16.mxu1 %v2258_v37 }
 0x4ea   : > { %2199 = vmatpush3.bf16.msra.mxu1 %v2198_v5 }
 0x4eb   : > { %2200 = vmatprep.subr.bf16.mxu1 %v2258_v37 }
 0x4ee   : > { %2202 = vmatpush3.bf16.msra.mxu1 %v2201_v8 }
 0x5a4   : > { %v1498_v35 = vpop.f32.mrb[18].mxu1 }
 0x5a5   : > { %v2078_v36 = vpop.f32.mrb[19].mxu1  ;;  %2112 = vmatmul.mubr.f32.vlgmr.msra.gmra.mrb[20].mxu1 %v1498_v35 }
 0x678   : > { %v1591_v41 = vpop.f32.mrb[20].mxu1 }
 0x679   : > { %v1592_v42 = vadd.f32 %v1792_v40, %v1591_v41  ;;  %v2113_v37 = vpop.f32.mrb[21].mxu1 }
 0x67b   : > { %v1595_v44 = vmax.f32 %v1592_v42, 0.0 }
 0x67d   : > { %2147 = vmatmul.mubr.f32.vlgmr.msra.gmra.mrb[18].mxu0 %v1595_v44 }
 0x750   : > { %v1685_v46 = vpop.f32.mrb[18].mxu0 }
 0x751   : > { %v1686_v48 = vadd.f32 %v1793_v45, %v1685_v46  ;;  %v2148_v49 = vpop.f32.mrb[19].mxu0 }
 0x753   : > { %v1689_v50 = vadd.f32 %v1686_v48, %v3271_v29 }
 0x755   : > { %1690 = vst [vmem:[%s410_s13] sm:$0xff] %v1689_v50 }
 0x756 PF: > { %s22_s17 = sadd.s32 1, %s2255_s17  }
 0x757   : > { %p19_p4 = scmp.ge.s32.totalorder %s22_s17, 4  }
 0x759   :  { %21 = sbr.rel (!%p19_p4) target bundleno = 1 (0x1), region = 105 }

</bundles_post_ra>
